<compile_context>
chip_gen: v5e
topology: v5e:2x2
jax: 0.10.0
libtpu: 0.0.40
codegen_flags: <defaults>
</compile_context>

<pallas_src>
import functools
import math

import jax
import jax.numpy as jnp
from jax.experimental import pallas as pl


# ----------------------------- kernel helpers -------------------------------

def _layernorm(x, gamma, beta, eps=1e-5):
    # x: (R, D) f32; gamma/beta: (1, D) f32.  Biased variance (PyTorch LayerNorm).
    mean = jnp.mean(x, axis=-1, keepdims=True)
    var = jnp.mean((x - mean) ** 2, axis=-1, keepdims=True)
    return (x - mean) * jax.lax.rsqrt(var + eps) * gamma + beta


def _gelu_exact(x):
    # exact (erf-based) GELU, matching torch.nn.GELU() default
    return 0.5 * x * (1.0 + jax.lax.erf(x * (1.0 / math.sqrt(2.0))))


# ---------------- fused PreNorm(Attn)+res ; PreNorm(FF)+res kernel ----------

def layer_kernel(x_ref,
                 ag_ref, ab_ref, wqkv_ref, wout_ref, bout_ref,
                 fg_ref, fb_ref, w1_ref, b1_ref, w2_ref, b2_ref,
                 o_ref, *, heads, dim_head):
    B, N, D = x_ref.shape
    inner = heads * dim_head
    scale = dim_head ** (-0.5)

    # Fold batch into the matmul row dim: all projections run on a (B*N, D) slab.
    x = x_ref[...].reshape(B * N, D)                               # f32

    # ---------------- PreNorm(Attention) + residual ----------------
    y = _layernorm(x, ag_ref[...], ab_ref[...])                    # (B*N, D) f32
    qkv = jnp.dot(y.astype(jnp.bfloat16), wqkv_ref[...],           # bf16 x bf16 -> f32
                  preferred_element_type=jnp.float32)              # (B*N, 3*inner)

    head_outs = []
    for h in range(heads):                                         # static, small unroll
        qs = slice(h * dim_head, (h + 1) * dim_head)
        ks = slice(inner + h * dim_head, inner + (h + 1) * dim_head)
        vs = slice(2 * inner + h * dim_head, 2 * inner + (h + 1) * dim_head)
        # scale folded into q (touches N*dh elems, not N*N scores)
        q = (qkv[:, qs] * scale).reshape(B, N, dim_head)
        k = qkv[:, ks].reshape(B, N, dim_head)
        v = qkv[:, vs].reshape(B, N, dim_head)
        # batched over B: one MXU contraction per head instead of per (batch, head)
        s = jnp.einsum('bqd,bkd->bqk', q.astype(jnp.bfloat16), k.astype(jnp.bfloat16),
                       preferred_element_type=jnp.float32)         # (B, N, N) f32
        s = s - jnp.max(s, axis=-1, keepdims=True)
        e = jnp.exp(s)
        p = e * pl.reciprocal(jnp.sum(e, axis=-1, keepdims=True), approx=True)
        oh = jnp.einsum('bqk,bkd->bqd', p.astype(jnp.bfloat16), v.astype(jnp.bfloat16),
                        preferred_element_type=jnp.float32)        # (B, N, dh)
        head_outs.append(oh.reshape(B * N, dim_head))
    att = jnp.concatenate(head_outs, axis=-1)                      # 'b n (h d)' -> (B*N, inner)

    att = jnp.dot(att.astype(jnp.bfloat16), wout_ref[...],
                  preferred_element_type=jnp.float32) + bout_ref[...]
    x = x + att                                                    # residual (f32)

    # ---------------- PreNorm(FeedForward) + residual ----------------
    y = _layernorm(x, fg_ref[...], fb_ref[...])
    h1 = jnp.dot(y.astype(jnp.bfloat16), w1_ref[...],
                 preferred_element_type=jnp.float32) + b1_ref[...]
    h1 = _gelu_exact(h1)                                           # f32 elementwise
    ff = jnp.dot(h1.astype(jnp.bfloat16), w2_ref[...],
                 preferred_element_type=jnp.float32) + b2_ref[...]
    x = x + ff                                                     # residual (f32)

    o_ref[...] = x.reshape(B, N, D)


# ------------------------------ pallas wrappers ------------------------------

def transformer_layer(x, attn_p, ff_p, heads, dim_head):
    B, N, D = x.shape
    kernel = functools.partial(layer_kernel, heads=heads, dim_head=dim_head)
    # Whole-array blocks (everything fits comfortably in VMEM at these shapes);
    # no per-batch grid -> no per-step overhead, projections see all B*N rows.
    # TODO(synk): for large D / mlp_dim, add a K-dim grid axis (stream weight tiles
    # with a VMEM f32 accumulator) and a fused B*seq row-tile axis for multi-core.
    return pl.pallas_call(
        kernel,
        out_shape=jax.ShapeDtypeStruct((B, N, D), x.dtype),
    )(x,
      attn_p["ln_g"], attn_p["ln_b"], attn_p["w_qkv"], attn_p["w_out"], attn_p["b_out"],
      ff_p["ln_g"], ff_p["ln_b"], ff_p["w1"], ff_p["b1"], ff_p["w2"], ff_p["b2"])


@functools.partial(jax.jit, static_argnames=("heads", "dim_head"))
def transformer_forward(x, layers, heads, dim_head):
    # for attn, ff in self.layers: x = attn(x) + x ; x = ff(x) + x  (residuals fused in-kernel)
    for attn_p, ff_p in layers:
        x = transformer_layer(x, attn_p, ff_p, heads, dim_head)
    return x


# ------------------------------ parameter init -------------------------------

def init_transformer_params(key, dim, depth, heads, dim_head, mlp_dim):
    inner = heads * dim_head
    layers = []
    for _ in range(depth):
        key, k1, k2, k3, k4, k5, k6 = jax.random.split(key, 7)
        attn_p = {
            "ln_g": jnp.ones((1, dim), jnp.float32),
            "ln_b": jnp.zeros((1, dim), jnp.float32),
            # matmul weights stored bf16 (halves HBM->VMEM bytes); accumulation stays f32
            "w_qkv": (0.02 * jax.random.normal(k1, (dim, 3 * inner), jnp.float32)).astype(jnp.bfloat16),
            "w_out": (0.02 * jax.random.normal(k2, (inner, dim), jnp.float32)).astype(jnp.bfloat16),
            "b_out": 0.02 * jax.random.normal(k3, (1, dim), jnp.float32),
        }
        ff_p = {
            "ln_g": jnp.ones((1, dim), jnp.float32),
            "ln_b": jnp.zeros((1, dim), jnp.float32),
            "w1": (0.02 * jax.random.normal(k4, (dim, mlp_dim), jnp.float32)).astype(jnp.bfloat16),
            "b1": 0.02 * jax.random.normal(k5, (1, mlp_dim), jnp.float32),
            "w2": (0.02 * jax.random.normal(k6, (mlp_dim, dim), jnp.float32)).astype(jnp.bfloat16),
            "b2": jnp.zeros((1, dim), jnp.float32),
        }
        layers.append((attn_p, ff_p))
    return layers


# ----------------------------------- main ------------------------------------

if __name__ == "__main__":
    B, N = 2, 8               # batch, sequence length
    dim = 32                  # embedding dim
    depth = 2
    heads = 4
    dim_head = 8              # inner_dim = 32
    mlp_dim = 64

    key = jax.random.PRNGKey(0)
    kx, kp = jax.random.split(key)
    x = jax.random.normal(kx, (B, N, dim), jnp.float32)

    layers = init_transformer_params(kp, dim, depth, heads, dim_head, mlp_dim)

    out = transformer_forward(x, layers, heads, dim_head)
    out = jax.block_until_ready(out)
    assert out.shape == (B, N, dim)
    assert out.dtype == jnp.float32
    print("KERNEL_OK")
</pallas_src>

<mosaic_0001>
module attributes {stable_mosaic.version = 11 : i64} {
  func.func @layer_kernel(%arg0: memref<2x8x32xf32, #tpu.memory_space<vmem>>, %arg1: memref<1x32xf32, #tpu.memory_space<vmem>>, %arg2: memref<1x32xf32, #tpu.memory_space<vmem>>, %arg3: memref<32x96xbf16, #tpu.memory_space<vmem>>, %arg4: memref<32x32xbf16, #tpu.memory_space<vmem>>, %arg5: memref<1x32xf32, #tpu.memory_space<vmem>>, %arg6: memref<1x32xf32, #tpu.memory_space<vmem>>, %arg7: memref<1x32xf32, #tpu.memory_space<vmem>>, %arg8: memref<32x64xbf16, #tpu.memory_space<vmem>>, %arg9: memref<1x64xf32, #tpu.memory_space<vmem>>, %arg10: memref<64x32xbf16, #tpu.memory_space<vmem>>, %arg11: memref<1x32xf32, #tpu.memory_space<vmem>>, %arg12: memref<2x8x32xf32, #tpu.memory_space<vmem>>) attributes {dimension_semantics = [], scalar_prefetch = 0 : i64, scratch_operands = 0 : i64, tpu.core_type = #tpu.core_type<tc>} {
    %c0 = arith.constant 0 : index
    %c0_0 = arith.constant 0 : index
    %c0_1 = arith.constant 0 : index
    %0 = vector.load %arg0[%c0, %c0_0, %c0_1] : memref<2x8x32xf32, #tpu.memory_space<vmem>>, vector<2x8x32xf32>
    %1 = vector.shape_cast %0 : vector<2x8x32xf32> to vector<16x32xf32>
    %c0_2 = arith.constant 0 : index
    %c0_3 = arith.constant 0 : index
    %2 = vector.load %arg1[%c0_2, %c0_3] : memref<1x32xf32, #tpu.memory_space<vmem>>, vector<1x32xf32>
    %c0_4 = arith.constant 0 : index
    %c0_5 = arith.constant 0 : index
    %3 = vector.load %arg2[%c0_4, %c0_5] : memref<1x32xf32, #tpu.memory_space<vmem>>, vector<1x32xf32>
    %cst = arith.constant dense<0.000000e+00> : vector<16xf32>
    %4 = vector.multi_reduction <add>, %1, %cst [1] : vector<16x32xf32> to vector<16xf32>
    %5 = vector.shape_cast %4 : vector<16xf32> to vector<16x1xf32>
    %cst_6 = arith.constant 3.200000e+01 : f32
    %6 = vector.broadcast %cst_6 : f32 to vector<16x1xf32>
    %7 = arith.divf %5, %6 : vector<16x1xf32>
    %8 = vector.broadcast %7 : vector<16x1xf32> to vector<16x32xf32>
    %9 = arith.subf %1, %8 : vector<16x32xf32>
    %10 = arith.mulf %9, %9 : vector<16x32xf32>
    %cst_7 = arith.constant dense<0.000000e+00> : vector<16xf32>
    %11 = vector.multi_reduction <add>, %10, %cst_7 [1] : vector<16x32xf32> to vector<16xf32>
    %12 = vector.shape_cast %11 : vector<16xf32> to vector<16x1xf32>
    %cst_8 = arith.constant 3.200000e+01 : f32
    %13 = vector.broadcast %cst_8 : f32 to vector<16x1xf32>
    %14 = arith.divf %12, %13 : vector<16x1xf32>
    %15 = vector.broadcast %7 : vector<16x1xf32> to vector<16x32xf32>
    %16 = arith.subf %1, %15 : vector<16x32xf32>
    %cst_9 = arith.constant 9.99999974E-6 : f32
    %17 = vector.broadcast %cst_9 : f32 to vector<16x1xf32>
    %18 = arith.addf %14, %17 : vector<16x1xf32>
    %19 = math.rsqrt %18 : vector<16x1xf32>
    %20 = vector.broadcast %19 : vector<16x1xf32> to vector<16x32xf32>
    %21 = arith.mulf %16, %20 : vector<16x32xf32>
    %22 = vector.broadcast %2 : vector<1x32xf32> to vector<16x32xf32>
    %23 = arith.mulf %21, %22 : vector<16x32xf32>
    %24 = vector.broadcast %3 : vector<1x32xf32> to vector<16x32xf32>
    %25 = arith.addf %23, %24 : vector<16x32xf32>
    %26 = arith.truncf %25 : vector<16x32xf32> to vector<16x32xbf16>
    %c0_10 = arith.constant 0 : index
    %c0_11 = arith.constant 0 : index
    %27 = vector.load %arg3[%c0_10, %c0_11] : memref<32x96xbf16, #tpu.memory_space<vmem>>, vector<32x96xbf16>
    %cst_12 = arith.constant dense<0.000000e+00> : vector<16x96xf32>
    %28 = tpu.matmul %26, %27, %cst_12 {dimension_numbers = #tpu.dot_dimension_numbers<[1], [0], [0], [1], [0, 0, 1, 1], [], []>} : vector<16x32xbf16>, vector<32x96xbf16>, vector<16x96xf32> -> vector<16x96xf32>
    %29 = vector.extract_strided_slice %28 {offsets = [0, 0], sizes = [16, 8], strides = [1, 1]} : vector<16x96xf32> to vector<16x8xf32>
    %cst_13 = arith.constant 0.353553385 : f32
    %30 = vector.broadcast %cst_13 : f32 to vector<16x8xf32>
    %31 = arith.mulf %29, %30 : vector<16x8xf32>
    %32 = vector.shape_cast %31 : vector<16x8xf32> to vector<2x8x8xf32>
    %33 = vector.extract_strided_slice %28 {offsets = [0, 32], sizes = [16, 8], strides = [1, 1]} : vector<16x96xf32> to vector<16x8xf32>
    %34 = vector.shape_cast %33 : vector<16x8xf32> to vector<2x8x8xf32>
    %35 = vector.extract_strided_slice %28 {offsets = [0, 64], sizes = [16, 8], strides = [1, 1]} : vector<16x96xf32> to vector<16x8xf32>
    %36 = vector.shape_cast %35 : vector<16x8xf32> to vector<2x8x8xf32>
    %37 = arith.truncf %32 : vector<2x8x8xf32> to vector<2x8x8xbf16>
    %38 = arith.truncf %34 : vector<2x8x8xf32> to vector<2x8x8xbf16>
    "tpu.trace_start"() <{level = 10 : i32, message = "bqd,bkd->bqk"}> : () -> ()
    %cst_14 = arith.constant dense<0.000000e+00> : vector<2x8x8xf32>
    %39 = tpu.matmul %37, %38, %cst_14 {dimension_numbers = #tpu.dot_dimension_numbers<[2], [2], [1], [1], [0, 0, 0, 1, 1, 1], [0], [0]>} : vector<2x8x8xbf16>, vector<2x8x8xbf16>, vector<2x8x8xf32> -> vector<2x8x8xf32>
    "tpu.trace_stop"() : () -> ()
    %cst_15 = arith.constant dense<0xFF800000> : vector<2x8xf32>
    %40 = vector.multi_reduction <maximumf>, %39, %cst_15 [2] : vector<2x8x8xf32> to vector<2x8xf32>
    %41 = vector.shape_cast %40 : vector<2x8xf32> to vector<2x8x1xf32>
    %42 = vector.broadcast %41 : vector<2x8x1xf32> to vector<2x8x8xf32>
    %43 = arith.subf %39, %42 : vector<2x8x8xf32>
    %44 = math.exp %43 : vector<2x8x8xf32>
    %cst_16 = arith.constant dense<0.000000e+00> : vector<2x8xf32>
    %45 = vector.multi_reduction <add>, %44, %cst_16 [2] : vector<2x8x8xf32> to vector<2x8xf32>
    %46 = vector.shape_cast %45 : vector<2x8xf32> to vector<2x8x1xf32>
    %47 = tpu.reciprocal %46 {approx = true} : vector<2x8x1xf32> -> vector<2x8x1xf32>
    %48 = vector.broadcast %47 : vector<2x8x1xf32> to vector<2x8x8xf32>
    %49 = arith.mulf %44, %48 : vector<2x8x8xf32>
    %50 = arith.truncf %49 : vector<2x8x8xf32> to vector<2x8x8xbf16>
    %51 = arith.truncf %36 : vector<2x8x8xf32> to vector<2x8x8xbf16>
    "tpu.trace_start"() <{level = 10 : i32, message = "bqk,bkd->bqd"}> : () -> ()
    %cst_17 = arith.constant dense<0.000000e+00> : vector<2x8x8xf32>
    %52 = tpu.matmul %50, %51, %cst_17 {dimension_numbers = #tpu.dot_dimension_numbers<[2], [1], [1], [2], [0, 0, 0, 1, 1, 2], [0], [0]>} : vector<2x8x8xbf16>, vector<2x8x8xbf16>, vector<2x8x8xf32> -> vector<2x8x8xf32>
    "tpu.trace_stop"() : () -> ()
    %53 = vector.shape_cast %52 : vector<2x8x8xf32> to vector<16x8xf32>
    %54 = vector.extract_strided_slice %28 {offsets = [0, 8], sizes = [16, 8], strides = [1, 1]} : vector<16x96xf32> to vector<16x8xf32>
    %cst_18 = arith.constant 0.353553385 : f32
    %55 = vector.broadcast %cst_18 : f32 to vector<16x8xf32>
    %56 = arith.mulf %54, %55 : vector<16x8xf32>
    %57 = vector.shape_cast %56 : vector<16x8xf32> to vector<2x8x8xf32>
    %58 = vector.extract_strided_slice %28 {offsets = [0, 40], sizes = [16, 8], strides = [1, 1]} : vector<16x96xf32> to vector<16x8xf32>
    %59 = vector.shape_cast %58 : vector<16x8xf32> to vector<2x8x8xf32>
    %60 = vector.extract_strided_slice %28 {offsets = [0, 72], sizes = [16, 8], strides = [1, 1]} : vector<16x96xf32> to vector<16x8xf32>
    %61 = vector.shape_cast %60 : vector<16x8xf32> to vector<2x8x8xf32>
    %62 = arith.truncf %57 : vector<2x8x8xf32> to vector<2x8x8xbf16>
    %63 = arith.truncf %59 : vector<2x8x8xf32> to vector<2x8x8xbf16>
    "tpu.trace_start"() <{level = 10 : i32, message = "bqd,bkd->bqk"}> : () -> ()
    %cst_19 = arith.constant dense<0.000000e+00> : vector<2x8x8xf32>
    %64 = tpu.matmul %62, %63, %cst_19 {dimension_numbers = #tpu.dot_dimension_numbers<[2], [2], [1], [1], [0, 0, 0, 1, 1, 1], [0], [0]>} : vector<2x8x8xbf16>, vector<2x8x8xbf16>, vector<2x8x8xf32> -> vector<2x8x8xf32>
    "tpu.trace_stop"() : () -> ()
    %cst_20 = arith.constant dense<0xFF800000> : vector<2x8xf32>
    %65 = vector.multi_reduction <maximumf>, %64, %cst_20 [2] : vector<2x8x8xf32> to vector<2x8xf32>
    %66 = vector.shape_cast %65 : vector<2x8xf32> to vector<2x8x1xf32>
    %67 = vector.broadcast %66 : vector<2x8x1xf32> to vector<2x8x8xf32>
    %68 = arith.subf %64, %67 : vector<2x8x8xf32>
    %69 = math.exp %68 : vector<2x8x8xf32>
    %cst_21 = arith.constant dense<0.000000e+00> : vector<2x8xf32>
    %70 = vector.multi_reduction <add>, %69, %cst_21 [2] : vector<2x8x8xf32> to vector<2x8xf32>
    %71 = vector.shape_cast %70 : vector<2x8xf32> to vector<2x8x1xf32>
    %72 = tpu.reciprocal %71 {approx = true} : vector<2x8x1xf32> -> vector<2x8x1xf32>
    %73 = vector.broadcast %72 : vector<2x8x1xf32> to vector<2x8x8xf32>
    %74 = arith.mulf %69, %73 : vector<2x8x8xf32>
    %75 = arith.truncf %74 : vector<2x8x8xf32> to vector<2x8x8xbf16>
    %76 = arith.truncf %61 : vector<2x8x8xf32> to vector<2x8x8xbf16>
    "tpu.trace_start"() <{level = 10 : i32, message = "bqk,bkd->bqd"}> : () -> ()
    %cst_22 = arith.constant dense<0.000000e+00> : vector<2x8x8xf32>
    %77 = tpu.matmul %75, %76, %cst_22 {dimension_numbers = #tpu.dot_dimension_numbers<[2], [1], [1], [2], [0, 0, 0, 1, 1, 2], [0], [0]>} : vector<2x8x8xbf16>, vector<2x8x8xbf16>, vector<2x8x8xf32> -> vector<2x8x8xf32>
    "tpu.trace_stop"() : () -> ()
    %78 = vector.shape_cast %77 : vector<2x8x8xf32> to vector<16x8xf32>
    %79 = vector.extract_strided_slice %28 {offsets = [0, 16], sizes = [16, 8], strides = [1, 1]} : vector<16x96xf32> to vector<16x8xf32>
    %cst_23 = arith.constant 0.353553385 : f32
    %80 = vector.broadcast %cst_23 : f32 to vector<16x8xf32>
    %81 = arith.mulf %79, %80 : vector<16x8xf32>
    %82 = vector.shape_cast %81 : vector<16x8xf32> to vector<2x8x8xf32>
    %83 = vector.extract_strided_slice %28 {offsets = [0, 48], sizes = [16, 8], strides = [1, 1]} : vector<16x96xf32> to vector<16x8xf32>
    %84 = vector.shape_cast %83 : vector<16x8xf32> to vector<2x8x8xf32>
    %85 = vector.extract_strided_slice %28 {offsets = [0, 80], sizes = [16, 8], strides = [1, 1]} : vector<16x96xf32> to vector<16x8xf32>
    %86 = vector.shape_cast %85 : vector<16x8xf32> to vector<2x8x8xf32>
    %87 = arith.truncf %82 : vector<2x8x8xf32> to vector<2x8x8xbf16>
    %88 = arith.truncf %84 : vector<2x8x8xf32> to vector<2x8x8xbf16>
    "tpu.trace_start"() <{level = 10 : i32, message = "bqd,bkd->bqk"}> : () -> ()
    %cst_24 = arith.constant dense<0.000000e+00> : vector<2x8x8xf32>
    %89 = tpu.matmul %87, %88, %cst_24 {dimension_numbers = #tpu.dot_dimension_numbers<[2], [2], [1], [1], [0, 0, 0, 1, 1, 1], [0], [0]>} : vector<2x8x8xbf16>, vector<2x8x8xbf16>, vector<2x8x8xf32> -> vector<2x8x8xf32>
    "tpu.trace_stop"() : () -> ()
    %cst_25 = arith.constant dense<0xFF800000> : vector<2x8xf32>
    %90 = vector.multi_reduction <maximumf>, %89, %cst_25 [2] : vector<2x8x8xf32> to vector<2x8xf32>
    %91 = vector.shape_cast %90 : vector<2x8xf32> to vector<2x8x1xf32>
    %92 = vector.broadcast %91 : vector<2x8x1xf32> to vector<2x8x8xf32>
    %93 = arith.subf %89, %92 : vector<2x8x8xf32>
    %94 = math.exp %93 : vector<2x8x8xf32>
    %cst_26 = arith.constant dense<0.000000e+00> : vector<2x8xf32>
    %95 = vector.multi_reduction <add>, %94, %cst_26 [2] : vector<2x8x8xf32> to vector<2x8xf32>
    %96 = vector.shape_cast %95 : vector<2x8xf32> to vector<2x8x1xf32>
    %97 = tpu.reciprocal %96 {approx = true} : vector<2x8x1xf32> -> vector<2x8x1xf32>
    %98 = vector.broadcast %97 : vector<2x8x1xf32> to vector<2x8x8xf32>
    %99 = arith.mulf %94, %98 : vector<2x8x8xf32>
    %100 = arith.truncf %99 : vector<2x8x8xf32> to vector<2x8x8xbf16>
    %101 = arith.truncf %86 : vector<2x8x8xf32> to vector<2x8x8xbf16>
    "tpu.trace_start"() <{level = 10 : i32, message = "bqk,bkd->bqd"}> : () -> ()
    %cst_27 = arith.constant dense<0.000000e+00> : vector<2x8x8xf32>
    %102 = tpu.matmul %100, %101, %cst_27 {dimension_numbers = #tpu.dot_dimension_numbers<[2], [1], [1], [2], [0, 0, 0, 1, 1, 2], [0], [0]>} : vector<2x8x8xbf16>, vector<2x8x8xbf16>, vector<2x8x8xf32> -> vector<2x8x8xf32>
    "tpu.trace_stop"() : () -> ()
    %103 = vector.shape_cast %102 : vector<2x8x8xf32> to vector<16x8xf32>
    %104 = vector.extract_strided_slice %28 {offsets = [0, 24], sizes = [16, 8], strides = [1, 1]} : vector<16x96xf32> to vector<16x8xf32>
    %cst_28 = arith.constant 0.353553385 : f32
    %105 = vector.broadcast %cst_28 : f32 to vector<16x8xf32>
    %106 = arith.mulf %104, %105 : vector<16x8xf32>
    %107 = vector.shape_cast %106 : vector<16x8xf32> to vector<2x8x8xf32>
    %108 = vector.extract_strided_slice %28 {offsets = [0, 56], sizes = [16, 8], strides = [1, 1]} : vector<16x96xf32> to vector<16x8xf32>
    %109 = vector.shape_cast %108 : vector<16x8xf32> to vector<2x8x8xf32>
    %110 = vector.extract_strided_slice %28 {offsets = [0, 88], sizes = [16, 8], strides = [1, 1]} : vector<16x96xf32> to vector<16x8xf32>
    %111 = vector.shape_cast %110 : vector<16x8xf32> to vector<2x8x8xf32>
    %112 = arith.truncf %107 : vector<2x8x8xf32> to vector<2x8x8xbf16>
    %113 = arith.truncf %109 : vector<2x8x8xf32> to vector<2x8x8xbf16>
    "tpu.trace_start"() <{level = 10 : i32, message = "bqd,bkd->bqk"}> : () -> ()
    %cst_29 = arith.constant dense<0.000000e+00> : vector<2x8x8xf32>
    %114 = tpu.matmul %112, %113, %cst_29 {dimension_numbers = #tpu.dot_dimension_numbers<[2], [2], [1], [1], [0, 0, 0, 1, 1, 1], [0], [0]>} : vector<2x8x8xbf16>, vector<2x8x8xbf16>, vector<2x8x8xf32> -> vector<2x8x8xf32>
    "tpu.trace_stop"() : () -> ()
    %cst_30 = arith.constant dense<0xFF800000> : vector<2x8xf32>
    %115 = vector.multi_reduction <maximumf>, %114, %cst_30 [2] : vector<2x8x8xf32> to vector<2x8xf32>
    %116 = vector.shape_cast %115 : vector<2x8xf32> to vector<2x8x1xf32>
    %117 = vector.broadcast %116 : vector<2x8x1xf32> to vector<2x8x8xf32>
    %118 = arith.subf %114, %117 : vector<2x8x8xf32>
    %119 = math.exp %118 : vector<2x8x8xf32>
    %cst_31 = arith.constant dense<0.000000e+00> : vector<2x8xf32>
    %120 = vector.multi_reduction <add>, %119, %cst_31 [2] : vector<2x8x8xf32> to vector<2x8xf32>
    %121 = vector.shape_cast %120 : vector<2x8xf32> to vector<2x8x1xf32>
    %122 = tpu.reciprocal %121 {approx = true} : vector<2x8x1xf32> -> vector<2x8x1xf32>
    %123 = vector.broadcast %122 : vector<2x8x1xf32> to vector<2x8x8xf32>
    %124 = arith.mulf %119, %123 : vector<2x8x8xf32>
    %125 = arith.truncf %124 : vector<2x8x8xf32> to vector<2x8x8xbf16>
    %126 = arith.truncf %111 : vector<2x8x8xf32> to vector<2x8x8xbf16>
    "tpu.trace_start"() <{level = 10 : i32, message = "bqk,bkd->bqd"}> : () -> ()
    %cst_32 = arith.constant dense<0.000000e+00> : vector<2x8x8xf32>
    %127 = tpu.matmul %125, %126, %cst_32 {dimension_numbers = #tpu.dot_dimension_numbers<[2], [1], [1], [2], [0, 0, 0, 1, 1, 2], [0], [0]>} : vector<2x8x8xbf16>, vector<2x8x8xbf16>, vector<2x8x8xf32> -> vector<2x8x8xf32>
    "tpu.trace_stop"() : () -> ()
    %128 = vector.shape_cast %127 : vector<2x8x8xf32> to vector<16x8xf32>
    %129 = tpu.concatenate %53, %78, %103, %128 in 1 : vector<16x8xf32>, vector<16x8xf32>, vector<16x8xf32>, vector<16x8xf32> -> vector<16x32xf32>
    %130 = arith.truncf %129 : vector<16x32xf32> to vector<16x32xbf16>
    %c0_33 = arith.constant 0 : index
    %c0_34 = arith.constant 0 : index
    %131 = vector.load %arg4[%c0_33, %c0_34] : memref<32x32xbf16, #tpu.memory_space<vmem>>, vector<32x32xbf16>
    %cst_35 = arith.constant dense<0.000000e+00> : vector<16x32xf32>
    %132 = tpu.matmul %130, %131, %cst_35 {dimension_numbers = #tpu.dot_dimension_numbers<[1], [0], [0], [1], [0, 0, 1, 1], [], []>} : vector<16x32xbf16>, vector<32x32xbf16>, vector<16x32xf32> -> vector<16x32xf32>
    %c0_36 = arith.constant 0 : index
    %c0_37 = arith.constant 0 : index
    %133 = vector.load %arg5[%c0_36, %c0_37] : memref<1x32xf32, #tpu.memory_space<vmem>>, vector<1x32xf32>
    %134 = vector.broadcast %133 : vector<1x32xf32> to vector<16x32xf32>
    %135 = arith.addf %132, %134 : vector<16x32xf32>
    %136 = arith.addf %1, %135 : vector<16x32xf32>
    %c0_38 = arith.constant 0 : index
    %c0_39 = arith.constant 0 : index
    %137 = vector.load %arg6[%c0_38, %c0_39] : memref<1x32xf32, #tpu.memory_space<vmem>>, vector<1x32xf32>
    %c0_40 = arith.constant 0 : index
    %c0_41 = arith.constant 0 : index
    %138 = vector.load %arg7[%c0_40, %c0_41] : memref<1x32xf32, #tpu.memory_space<vmem>>, vector<1x32xf32>
    %cst_42 = arith.constant dense<0.000000e+00> : vector<16xf32>
    %139 = vector.multi_reduction <add>, %136, %cst_42 [1] : vector<16x32xf32> to vector<16xf32>
    %140 = vector.shape_cast %139 : vector<16xf32> to vector<16x1xf32>
    %cst_43 = arith.constant 3.200000e+01 : f32
    %141 = vector.broadcast %cst_43 : f32 to vector<16x1xf32>
    %142 = arith.divf %140, %141 : vector<16x1xf32>
    %143 = vector.broadcast %142 : vector<16x1xf32> to vector<16x32xf32>
    %144 = arith.subf %136, %143 : vector<16x32xf32>
    %145 = arith.mulf %144, %144 : vector<16x32xf32>
    %cst_44 = arith.constant dense<0.000000e+00> : vector<16xf32>
    %146 = vector.multi_reduction <add>, %145, %cst_44 [1] : vector<16x32xf32> to vector<16xf32>
    %147 = vector.shape_cast %146 : vector<16xf32> to vector<16x1xf32>
    %cst_45 = arith.constant 3.200000e+01 : f32
    %148 = vector.broadcast %cst_45 : f32 to vector<16x1xf32>
    %149 = arith.divf %147, %148 : vector<16x1xf32>
    %150 = vector.broadcast %142 : vector<16x1xf32> to vector<16x32xf32>
    %151 = arith.subf %136, %150 : vector<16x32xf32>
    %cst_46 = arith.constant 9.99999974E-6 : f32
    %152 = vector.broadcast %cst_46 : f32 to vector<16x1xf32>
    %153 = arith.addf %149, %152 : vector<16x1xf32>
    %154 = math.rsqrt %153 : vector<16x1xf32>
    %155 = vector.broadcast %154 : vector<16x1xf32> to vector<16x32xf32>
    %156 = arith.mulf %151, %155 : vector<16x32xf32>
    %157 = vector.broadcast %137 : vector<1x32xf32> to vector<16x32xf32>
    %158 = arith.mulf %156, %157 : vector<16x32xf32>
    %159 = vector.broadcast %138 : vector<1x32xf32> to vector<16x32xf32>
    %160 = arith.addf %158, %159 : vector<16x32xf32>
    %161 = arith.truncf %160 : vector<16x32xf32> to vector<16x32xbf16>
    %c0_47 = arith.constant 0 : index
    %c0_48 = arith.constant 0 : index
    %162 = vector.load %arg8[%c0_47, %c0_48] : memref<32x64xbf16, #tpu.memory_space<vmem>>, vector<32x64xbf16>
    %cst_49 = arith.constant dense<0.000000e+00> : vector<16x64xf32>
    %163 = tpu.matmul %161, %162, %cst_49 {dimension_numbers = #tpu.dot_dimension_numbers<[1], [0], [0], [1], [0, 0, 1, 1], [], []>} : vector<16x32xbf16>, vector<32x64xbf16>, vector<16x64xf32> -> vector<16x64xf32>
    %c0_50 = arith.constant 0 : index
    %c0_51 = arith.constant 0 : index
    %164 = vector.load %arg9[%c0_50, %c0_51] : memref<1x64xf32, #tpu.memory_space<vmem>>, vector<1x64xf32>
    %165 = vector.broadcast %164 : vector<1x64xf32> to vector<16x64xf32>
    %166 = arith.addf %163, %165 : vector<16x64xf32>
    %cst_52 = arith.constant 5.000000e-01 : f32
    %167 = vector.broadcast %cst_52 : f32 to vector<16x64xf32>
    %168 = arith.mulf %167, %166 : vector<16x64xf32>
    %cst_53 = arith.constant 0.707106769 : f32
    %169 = vector.broadcast %cst_53 : f32 to vector<16x64xf32>
    %170 = arith.mulf %166, %169 : vector<16x64xf32>
    %171 = math.erf %170 : vector<16x64xf32>
    %cst_54 = arith.constant 1.000000e+00 : f32
    %172 = vector.broadcast %cst_54 : f32 to vector<16x64xf32>
    %173 = arith.addf %172, %171 : vector<16x64xf32>
    %174 = arith.mulf %168, %173 : vector<16x64xf32>
    %175 = arith.truncf %174 : vector<16x64xf32> to vector<16x64xbf16>
    %c0_55 = arith.constant 0 : index
    %c0_56 = arith.constant 0 : index
    %176 = vector.load %arg10[%c0_55, %c0_56] : memref<64x32xbf16, #tpu.memory_space<vmem>>, vector<64x32xbf16>
    %cst_57 = arith.constant dense<0.000000e+00> : vector<16x32xf32>
    %177 = tpu.matmul %175, %176, %cst_57 {dimension_numbers = #tpu.dot_dimension_numbers<[1], [0], [0], [1], [0, 0, 1, 1], [], []>} : vector<16x64xbf16>, vector<64x32xbf16>, vector<16x32xf32> -> vector<16x32xf32>
    %c0_58 = arith.constant 0 : index
    %c0_59 = arith.constant 0 : index
    %178 = vector.load %arg11[%c0_58, %c0_59] : memref<1x32xf32, #tpu.memory_space<vmem>>, vector<1x32xf32>
    %179 = vector.broadcast %178 : vector<1x32xf32> to vector<16x32xf32>
    %180 = arith.addf %177, %179 : vector<16x32xf32>
    %181 = arith.addf %136, %180 : vector<16x32xf32>
    %182 = vector.shape_cast %181 : vector<16x32xf32> to vector<2x8x32xf32>
    %c0_60 = arith.constant 0 : index
    %c0_61 = arith.constant 0 : index
    %c0_62 = arith.constant 0 : index
    %183 = vector.load %arg12[%c0_60, %c0_61, %c0_62] : memref<2x8x32xf32, #tpu.memory_space<vmem>>, vector<2x8x32xf32>
    tpu.vector_store %arg12[%c0_60, %c0_61, %c0_62], %182 {strides = array<i32>} : memref<2x8x32xf32, #tpu.memory_space<vmem>>, vector<2x8x32xf32>,
    return
  }
}

module attributes {stable_mosaic.version = 11 : i64} {
  func.func @layer_kernel(%arg0: memref<2x8x32xf32, #tpu.memory_space<vmem>>, %arg1: memref<1x32xf32, #tpu.memory_space<vmem>>, %arg2: memref<1x32xf32, #tpu.memory_space<vmem>>, %arg3: memref<32x96xbf16, #tpu.memory_space<vmem>>, %arg4: memref<32x32xbf16, #tpu.memory_space<vmem>>, %arg5: memref<1x32xf32, #tpu.memory_space<vmem>>, %arg6: memref<1x32xf32, #tpu.memory_space<vmem>>, %arg7: memref<1x32xf32, #tpu.memory_space<vmem>>, %arg8: memref<32x64xbf16, #tpu.memory_space<vmem>>, %arg9: memref<1x64xf32, #tpu.memory_space<vmem>>, %arg10: memref<64x32xbf16, #tpu.memory_space<vmem>>, %arg11: memref<1x32xf32, #tpu.memory_space<vmem>>, %arg12: memref<2x8x32xf32, #tpu.memory_space<vmem>>) attributes {dimension_semantics = [], scalar_prefetch = 0 : i64, scratch_operands = 0 : i64, tpu.core_type = #tpu.core_type<tc>} {
    %c0 = arith.constant 0 : index
    %c0_0 = arith.constant 0 : index
    %c0_1 = arith.constant 0 : index
    %0 = vector.load %arg0[%c0, %c0_0, %c0_1] : memref<2x8x32xf32, #tpu.memory_space<vmem>>, vector<2x8x32xf32>
    %1 = vector.shape_cast %0 : vector<2x8x32xf32> to vector<16x32xf32>
    %c0_2 = arith.constant 0 : index
    %c0_3 = arith.constant 0 : index
    %2 = vector.load %arg1[%c0_2, %c0_3] : memref<1x32xf32, #tpu.memory_space<vmem>>, vector<1x32xf32>
    %c0_4 = arith.constant 0 : index
    %c0_5 = arith.constant 0 : index
    %3 = vector.load %arg2[%c0_4, %c0_5] : memref<1x32xf32, #tpu.memory_space<vmem>>, vector<1x32xf32>
    %cst = arith.constant dense<0.000000e+00> : vector<16xf32>
    %4 = vector.multi_reduction <add>, %1, %cst [1] : vector<16x32xf32> to vector<16xf32>
    %5 = vector.shape_cast %4 : vector<16xf32> to vector<16x1xf32>
    %cst_6 = arith.constant 3.200000e+01 : f32
    %6 = vector.broadcast %cst_6 : f32 to vector<16x1xf32>
    %7 = arith.divf %5, %6 : vector<16x1xf32>
    %8 = vector.broadcast %7 : vector<16x1xf32> to vector<16x32xf32>
    %9 = arith.subf %1, %8 : vector<16x32xf32>
    %10 = arith.mulf %9, %9 : vector<16x32xf32>
    %cst_7 = arith.constant dense<0.000000e+00> : vector<16xf32>
    %11 = vector.multi_reduction <add>, %10, %cst_7 [1] : vector<16x32xf32> to vector<16xf32>
    %12 = vector.shape_cast %11 : vector<16xf32> to vector<16x1xf32>
    %cst_8 = arith.constant 3.200000e+01 : f32
    %13 = vector.broadcast %cst_8 : f32 to vector<16x1xf32>
    %14 = arith.divf %12, %13 : vector<16x1xf32>
    %15 = vector.broadcast %7 : vector<16x1xf32> to vector<16x32xf32>
    %16 = arith.subf %1, %15 : vector<16x32xf32>
    %cst_9 = arith.constant 9.99999974E-6 : f32
    %17 = vector.broadcast %cst_9 : f32 to vector<16x1xf32>
    %18 = arith.addf %14, %17 : vector<16x1xf32>
    %19 = math.rsqrt %18 : vector<16x1xf32>
    %20 = vector.broadcast %19 : vector<16x1xf32> to vector<16x32xf32>
    %21 = arith.mulf %16, %20 : vector<16x32xf32>
    %22 = vector.broadcast %2 : vector<1x32xf32> to vector<16x32xf32>
    %23 = arith.mulf %21, %22 : vector<16x32xf32>
    %24 = vector.broadcast %3 : vector<1x32xf32> to vector<16x32xf32>
    %25 = arith.addf %23, %24 : vector<16x32xf32>
    %26 = arith.truncf %25 : vector<16x32xf32> to vector<16x32xbf16>
    %c0_10 = arith.constant 0 : index
    %c0_11 = arith.constant 0 : index
    %27 = vector.load %arg3[%c0_10, %c0_11] : memref<32x96xbf16, #tpu.memory_space<vmem>>, vector<32x96xbf16>
    %cst_12 = arith.constant dense<0.000000e+00> : vector<16x96xf32>
    %28 = tpu.matmul %26, %27, %cst_12 {dimension_numbers = #tpu.dot_dimension_numbers<[1], [0], [0], [1], [0, 0, 1, 1], [], []>} : vector<16x32xbf16>, vector<32x96xbf16>, vector<16x96xf32> -> vector<16x96xf32>
    %29 = vector.extract_strided_slice %28 {offsets = [0, 0], sizes = [16, 8], strides = [1, 1]} : vector<16x96xf32> to vector<16x8xf32>
    %cst_13 = arith.constant 0.353553385 : f32
    %30 = vector.broadcast %cst_13 : f32 to vector<16x8xf32>
    %31 = arith.mulf %29, %30 : vector<16x8xf32>
    %32 = vector.shape_cast %31 : vector<16x8xf32> to vector<2x8x8xf32>
    %33 = vector.extract_strided_slice %28 {offsets = [0, 32], sizes = [16, 8], strides = [1, 1]} : vector<16x96xf32> to vector<16x8xf32>
    %34 = vector.shape_cast %33 : vector<16x8xf32> to vector<2x8x8xf32>
    %35 = vector.extract_strided_slice %28 {offsets = [0, 64], sizes = [16, 8], strides = [1, 1]} : vector<16x96xf32> to vector<16x8xf32>
    %36 = vector.shape_cast %35 : vector<16x8xf32> to vector<2x8x8xf32>
    %37 = arith.truncf %32 : vector<2x8x8xf32> to vector<2x8x8xbf16>
    %38 = arith.truncf %34 : vector<2x8x8xf32> to vector<2x8x8xbf16>
    "tpu.trace_start"() <{level = 10 : i32, message = "bqd,bkd->bqk"}> : () -> ()
    %cst_14 = arith.constant dense<0.000000e+00> : vector<2x8x8xf32>
    %39 = tpu.matmul %37, %38, %cst_14 {dimension_numbers = #tpu.dot_dimension_numbers<[2], [2], [1], [1], [0, 0, 0, 1, 1, 1], [0], [0]>} : vector<2x8x8xbf16>, vector<2x8x8xbf16>, vector<2x8x8xf32> -> vector<2x8x8xf32>
    "tpu.trace_stop"() : () -> ()
    %cst_15 = arith.constant dense<0xFF800000> : vector<2x8xf32>
    %40 = vector.multi_reduction <maximumf>, %39, %cst_15 [2] : vector<2x8x8xf32> to vector<2x8xf32>
    %41 = vector.shape_cast %40 : vector<2x8xf32> to vector<2x8x1xf32>
    %42 = vector.broadcast %41 : vector<2x8x1xf32> to vector<2x8x8xf32>
    %43 = arith.subf %39, %42 : vector<2x8x8xf32>
    %44 = math.exp %43 : vector<2x8x8xf32>
    %cst_16 = arith.constant dense<0.000000e+00> : vector<2x8xf32>
    %45 = vector.multi_reduction <add>, %44, %cst_16 [2] : vector<2x8x8xf32> to vector<2x8xf32>
    %46 = vector.shape_cast %45 : vector<2x8xf32> to vector<2x8x1xf32>
    %47 = tpu.reciprocal %46 {approx = true} : vector<2x8x1xf32> -> vector<2x8x1xf32>
    %48 = vector.broadcast %47 : vector<2x8x1xf32> to vector<2x8x8xf32>
    %49 = arith.mulf %44, %48 : vector<2x8x8xf32>
    %50 = arith.truncf %49 : vector<2x8x8xf32> to vector<2x8x8xbf16>
    %51 = arith.truncf %36 : vector<2x8x8xf32> to vector<2x8x8xbf16>
    "tpu.trace_start"() <{level = 10 : i32, message = "bqk,bkd->bqd"}> : () -> ()
    %cst_17 = arith.constant dense<0.000000e+00> : vector<2x8x8xf32>
    %52 = tpu.matmul %50, %51, %cst_17 {dimension_numbers = #tpu.dot_dimension_numbers<[2], [1], [1], [2], [0, 0, 0, 1, 1, 2], [0], [0]>} : vector<2x8x8xbf16>, vector<2x8x8xbf16>, vector<2x8x8xf32> -> vector<2x8x8xf32>
    "tpu.trace_stop"() : () -> ()
    %53 = vector.shape_cast %52 : vector<2x8x8xf32> to vector<16x8xf32>
    %54 = vector.extract_strided_slice %28 {offsets = [0, 8], sizes = [16, 8], strides = [1, 1]} : vector<16x96xf32> to vector<16x8xf32>
    %cst_18 = arith.constant 0.353553385 : f32
    %55 = vector.broadcast %cst_18 : f32 to vector<16x8xf32>
    %56 = arith.mulf %54, %55 : vector<16x8xf32>
    %57 = vector.shape_cast %56 : vector<16x8xf32> to vector<2x8x8xf32>
    %58 = vector.extract_strided_slice %28 {offsets = [0, 40], sizes = [16, 8], strides = [1, 1]} : vector<16x96xf32> to vector<16x8xf32>
    %59 = vector.shape_cast %58 : vector<16x8xf32> to vector<2x8x8xf32>
    %60 = vector.extract_strided_slice %28 {offsets = [0, 72], sizes = [16, 8], strides = [1, 1]} : vector<16x96xf32> to vector<16x8xf32>
    %61 = vector.shape_cast %60 : vector<16x8xf32> to vector<2x8x8xf32>
    %62 = arith.truncf %57 : vector<2x8x8xf32> to vector<2x8x8xbf16>
    %63 = arith.truncf %59 : vector<2x8x8xf32> to vector<2x8x8xbf16>
    "tpu.trace_start"() <{level = 10 : i32, message = "bqd,bkd->bqk"}> : () -> ()
    %cst_19 = arith.constant dense<0.000000e+00> : vector<2x8x8xf32>
    %64 = tpu.matmul %62, %63, %cst_19 {dimension_numbers = #tpu.dot_dimension_numbers<[2], [2], [1], [1], [0, 0, 0, 1, 1, 1], [0], [0]>} : vector<2x8x8xbf16>, vector<2x8x8xbf16>, vector<2x8x8xf32> -> vector<2x8x8xf32>
    "tpu.trace_stop"() : () -> ()
    %cst_20 = arith.constant dense<0xFF800000> : vector<2x8xf32>
    %65 = vector.multi_reduction <maximumf>, %64, %cst_20 [2] : vector<2x8x8xf32> to vector<2x8xf32>
    %66 = vector.shape_cast %65 : vector<2x8xf32> to vector<2x8x1xf32>
    %67 = vector.broadcast %66 : vector<2x8x1xf32> to vector<2x8x8xf32>
    %68 = arith.subf %64, %67 : vector<2x8x8xf32>
    %69 = math.exp %68 : vector<2x8x8xf32>
    %cst_21 = arith.constant dense<0.000000e+00> : vector<2x8xf32>
    %70 = vector.multi_reduction <add>, %69, %cst_21 [2] : vector<2x8x8xf32> to vector<2x8xf32>
    %71 = vector.shape_cast %70 : vector<2x8xf32> to vector<2x8x1xf32>
    %72 = tpu.reciprocal %71 {approx = true} : vector<2x8x1xf32> -> vector<2x8x1xf32>
    %73 = vector.broadcast %72 : vector<2x8x1xf32> to vector<2x8x8xf32>
    %74 = arith.mulf %69, %73 : vector<2x8x8xf32>
    %75 = arith.truncf %74 : vector<2x8x8xf32> to vector<2x8x8xbf16>
    %76 = arith.truncf %61 : vector<2x8x8xf32> to vector<2x8x8xbf16>
    "tpu.trace_start"() <{level = 10 : i32, message = "bqk,bkd->bqd"}> : () -> ()
    %cst_22 = arith.constant dense<0.000000e+00> : vector<2x8x8xf32>
    %77 = tpu.matmul %75, %76, %cst_22 {dimension_numbers = #tpu.dot_dimension_numbers<[2], [1], [1], [2], [0, 0, 0, 1, 1, 2], [0], [0]>} : vector<2x8x8xbf16>, vector<2x8x8xbf16>, vector<2x8x8xf32> -> vector<2x8x8xf32>
    "tpu.trace_stop"() : () -> ()
    %78 = vector.shape_cast %77 : vector<2x8x8xf32> to vector<16x8xf32>
    %79 = vector.extract_strided_slice %28 {offsets = [0, 16], sizes = [16, 8], strides = [1, 1]} : vector<16x96xf32> to vector<16x8xf32>
    %cst_23 = arith.constant 0.353553385 : f32
    %80 = vector.broadcast %cst_23 : f32 to vector<16x8xf32>
    %81 = arith.mulf %79, %80 : vector<16x8xf32>
    %82 = vector.shape_cast %81 : vector<16x8xf32> to vector<2x8x8xf32>
    %83 = vector.extract_strided_slice %28 {offsets = [0, 48], sizes = [16, 8], strides = [1, 1]} : vector<16x96xf32> to vector<16x8xf32>
    %84 = vector.shape_cast %83 : vector<16x8xf32> to vector<2x8x8xf32>
    %85 = vector.extract_strided_slice %28 {offsets = [0, 80], sizes = [16, 8], strides = [1, 1]} : vector<16x96xf32> to vector<16x8xf32>
    %86 = vector.shape_cast %85 : vector<16x8xf32> to vector<2x8x8xf32>
    %87 = arith.truncf %82 : vector<2x8x8xf32> to vector<2x8x8xbf16>
    %88 = arith.truncf %84 : vector<2x8x8xf32> to vector<2x8x8xbf16>
    "tpu.trace_start"() <{level = 10 : i32, message = "bqd,bkd->bqk"}> : () -> ()
    %cst_24 = arith.constant dense<0.000000e+00> : vector<2x8x8xf32>
    %89 = tpu.matmul %87, %88, %cst_24 {dimension_numbers = #tpu.dot_dimension_numbers<[2], [2], [1], [1], [0, 0, 0, 1, 1, 1], [0], [0]>} : vector<2x8x8xbf16>, vector<2x8x8xbf16>, vector<2x8x8xf32> -> vector<2x8x8xf32>
    "tpu.trace_stop"() : () -> ()
    %cst_25 = arith.constant dense<0xFF800000> : vector<2x8xf32>
    %90 = vector.multi_reduction <maximumf>, %89, %cst_25 [2] : vector<2x8x8xf32> to vector<2x8xf32>
    %91 = vector.shape_cast %90 : vector<2x8xf32> to vector<2x8x1xf32>
    %92 = vector.broadcast %91 : vector<2x8x1xf32> to vector<2x8x8xf32>
    %93 = arith.subf %89, %92 : vector<2x8x8xf32>
    %94 = math.exp %93 : vector<2x8x8xf32>
    %cst_26 = arith.constant dense<0.000000e+00> : vector<2x8xf32>
    %95 = vector.multi_reduction <add>, %94, %cst_26 [2] : vector<2x8x8xf32> to vector<2x8xf32>
    %96 = vector.shape_cast %95 : vector<2x8xf32> to vector<2x8x1xf32>
    %97 = tpu.reciprocal %96 {approx = true} : vector<2x8x1xf32> -> vector<2x8x1xf32>
    %98 = vector.broadcast %97 : vector<2x8x1xf32> to vector<2x8x8xf32>
    %99 = arith.mulf %94, %98 : vector<2x8x8xf32>
    %100 = arith.truncf %99 : vector<2x8x8xf32> to vector<2x8x8xbf16>
    %101 = arith.truncf %86 : vector<2x8x8xf32> to vector<2x8x8xbf16>
    "tpu.trace_start"() <{level = 10 : i32, message = "bqk,bkd->bqd"}> : () -> ()
    %cst_27 = arith.constant dense<0.000000e+00> : vector<2x8x8xf32>
    %102 = tpu.matmul %100, %101, %cst_27 {dimension_numbers = #tpu.dot_dimension_numbers<[2], [1], [1], [2], [0, 0, 0, 1, 1, 2], [0], [0]>} : vector<2x8x8xbf16>, vector<2x8x8xbf16>, vector<2x8x8xf32> -> vector<2x8x8xf32>
    "tpu.trace_stop"() : () -> ()
    %103 = vector.shape_cast %102 : vector<2x8x8xf32> to vector<16x8xf32>
    %104 = vector.extract_strided_slice %28 {offsets = [0, 24], sizes = [16, 8], strides = [1, 1]} : vector<16x96xf32> to vector<16x8xf32>
    %cst_28 = arith.constant 0.353553385 : f32
    %105 = vector.broadcast %cst_28 : f32 to vector<16x8xf32>
    %106 = arith.mulf %104, %105 : vector<16x8xf32>
    %107 = vector.shape_cast %106 : vector<16x8xf32> to vector<2x8x8xf32>
    %108 = vector.extract_strided_slice %28 {offsets = [0, 56], sizes = [16, 8], strides = [1, 1]} : vector<16x96xf32> to vector<16x8xf32>
    %109 = vector.shape_cast %108 : vector<16x8xf32> to vector<2x8x8xf32>
    %110 = vector.extract_strided_slice %28 {offsets = [0, 88], sizes = [16, 8], strides = [1, 1]} : vector<16x96xf32> to vector<16x8xf32>
    %111 = vector.shape_cast %110 : vector<16x8xf32> to vector<2x8x8xf32>
    %112 = arith.truncf %107 : vector<2x8x8xf32> to vector<2x8x8xbf16>
    %113 = arith.truncf %109 : vector<2x8x8xf32> to vector<2x8x8xbf16>
    "tpu.trace_start"() <{level = 10 : i32, message = "bqd,bkd->bqk"}> : () -> ()
    %cst_29 = arith.constant dense<0.000000e+00> : vector<2x8x8xf32>
    %114 = tpu.matmul %112, %113, %cst_29 {dimension_numbers = #tpu.dot_dimension_numbers<[2], [2], [1], [1], [0, 0, 0, 1, 1, 1], [0], [0]>} : vector<2x8x8xbf16>, vector<2x8x8xbf16>, vector<2x8x8xf32> -> vector<2x8x8xf32>
    "tpu.trace_stop"() : () -> ()
    %cst_30 = arith.constant dense<0xFF800000> : vector<2x8xf32>
    %115 = vector.multi_reduction <maximumf>, %114, %cst_30 [2] : vector<2x8x8xf32> to vector<2x8xf32>
    %116 = vector.shape_cast %115 : vector<2x8xf32> to vector<2x8x1xf32>
    %117 = vector.broadcast %116 : vector<2x8x1xf32> to vector<2x8x8xf32>
    %118 = arith.subf %114, %117 : vector<2x8x8xf32>
    %119 = math.exp %118 : vector<2x8x8xf32>
    %cst_31 = arith.constant dense<0.000000e+00> : vector<2x8xf32>
    %120 = vector.multi_reduction <add>, %119, %cst_31 [2] : vector<2x8x8xf32> to vector<2x8xf32>
    %121 = vector.shape_cast %120 : vector<2x8xf32> to vector<2x8x1xf32>
    %122 = tpu.reciprocal %121 {approx = true} : vector<2x8x1xf32> -> vector<2x8x1xf32>
    %123 = vector.broadcast %122 : vector<2x8x1xf32> to vector<2x8x8xf32>
    %124 = arith.mulf %119, %123 : vector<2x8x8xf32>
    %125 = arith.truncf %124 : vector<2x8x8xf32> to vector<2x8x8xbf16>
    %126 = arith.truncf %111 : vector<2x8x8xf32> to vector<2x8x8xbf16>
    "tpu.trace_start"() <{level = 10 : i32, message = "bqk,bkd->bqd"}> : () -> ()
    %cst_32 = arith.constant dense<0.000000e+00> : vector<2x8x8xf32>
    %127 = tpu.matmul %125, %126, %cst_32 {dimension_numbers = #tpu.dot_dimension_numbers<[2], [1], [1], [2], [0, 0, 0, 1, 1, 2], [0], [0]>} : vector<2x8x8xbf16>, vector<2x8x8xbf16>, vector<2x8x8xf32> -> vector<2x8x8xf32>
    "tpu.trace_stop"() : () -> ()
    %128 = vector.shape_cast %127 : vector<2x8x8xf32> to vector<16x8xf32>
    %129 = tpu.concatenate %53, %78, %103, %128 in 1 : vector<16x8xf32>, vector<16x8xf32>, vector<16x8xf32>, vector<16x8xf32> -> vector<16x32xf32>
    %130 = arith.truncf %129 : vector<16x32xf32> to vector<16x32xbf16>
    %c0_33 = arith.constant 0 : index
    %c0_34 = arith.constant 0 : index
    %131 = vector.load %arg4[%c0_33, %c0_34] : memref<32x32xbf16, #tpu.memory_space<vmem>>, vector<32x32xbf16>
    %cst_35 = arith.constant dense<0.000000e+00> : vector<16x32xf32>
    %132 = tpu.matmul %130, %131, %cst_35 {dimension_numbers = #tpu.dot_dimension_numbers<[1], [0], [0], [1], [0, 0, 1, 1], [], []>} : vector<16x32xbf16>, vector<32x32xbf16>, vector<16x32xf32> -> vector<16x32xf32>
    %c0_36 = arith.constant 0 : index
    %c0_37 = arith.constant 0 : index
    %133 = vector.load %arg5[%c0_36, %c0_37] : memref<1x32xf32, #tpu.memory_space<vmem>>, vector<1x32xf32>
    %134 = vector.broadcast %133 : vector<1x32xf32> to vector<16x32xf32>
    %135 = arith.addf %132, %134 : vector<16x32xf32>
    %136 = arith.addf %1, %135 : vector<16x32xf32>
    %c0_38 = arith.constant 0 : index
    %c0_39 = arith.constant 0 : index
    %137 = vector.load %arg6[%c0_38, %c0_39] : memref<1x32xf32, #tpu.memory_space<vmem>>, vector<1x32xf32>
    %c0_40 = arith.constant 0 : index
    %c0_41 = arith.constant 0 : index
    %138 = vector.load %arg7[%c0_40, %c0_41] : memref<1x32xf32, #tpu.memory_space<vmem>>, vector<1x32xf32>
    %cst_42 = arith.constant dense<0.000000e+00> : vector<16xf32>
    %139 = vector.multi_reduction <add>, %136, %cst_42 [1] : vector<16x32xf32> to vector<16xf32>
    %140 = vector.shape_cast %139 : vector<16xf32> to vector<16x1xf32>
    %cst_43 = arith.constant 3.200000e+01 : f32
    %141 = vector.broadcast %cst_43 : f32 to vector<16x1xf32>
    %142 = arith.divf %140, %141 : vector<16x1xf32>
    %143 = vector.broadcast %142 : vector<16x1xf32> to vector<16x32xf32>
    %144 = arith.subf %136, %143 : vector<16x32xf32>
    %145 = arith.mulf %144, %144 : vector<16x32xf32>
    %cst_44 = arith.constant dense<0.000000e+00> : vector<16xf32>
    %146 = vector.multi_reduction <add>, %145, %cst_44 [1] : vector<16x32xf32> to vector<16xf32>
    %147 = vector.shape_cast %146 : vector<16xf32> to vector<16x1xf32>
    %cst_45 = arith.constant 3.200000e+01 : f32
    %148 = vector.broadcast %cst_45 : f32 to vector<16x1xf32>
    %149 = arith.divf %147, %148 : vector<16x1xf32>
    %150 = vector.broadcast %142 : vector<16x1xf32> to vector<16x32xf32>
    %151 = arith.subf %136, %150 : vector<16x32xf32>
    %cst_46 = arith.constant 9.99999974E-6 : f32
    %152 = vector.broadcast %cst_46 : f32 to vector<16x1xf32>
    %153 = arith.addf %149, %152 : vector<16x1xf32>
    %154 = math.rsqrt %153 : vector<16x1xf32>
    %155 = vector.broadcast %154 : vector<16x1xf32> to vector<16x32xf32>
    %156 = arith.mulf %151, %155 : vector<16x32xf32>
    %157 = vector.broadcast %137 : vector<1x32xf32> to vector<16x32xf32>
    %158 = arith.mulf %156, %157 : vector<16x32xf32>
    %159 = vector.broadcast %138 : vector<1x32xf32> to vector<16x32xf32>
    %160 = arith.addf %158, %159 : vector<16x32xf32>
    %161 = arith.truncf %160 : vector<16x32xf32> to vector<16x32xbf16>
    %c0_47 = arith.constant 0 : index
    %c0_48 = arith.constant 0 : index
    %162 = vector.load %arg8[%c0_47, %c0_48] : memref<32x64xbf16, #tpu.memory_space<vmem>>, vector<32x64xbf16>
    %cst_49 = arith.constant dense<0.000000e+00> : vector<16x64xf32>
    %163 = tpu.matmul %161, %162, %cst_49 {dimension_numbers = #tpu.dot_dimension_numbers<[1], [0], [0], [1], [0, 0, 1, 1], [], []>} : vector<16x32xbf16>, vector<32x64xbf16>, vector<16x64xf32> -> vector<16x64xf32>
    %c0_50 = arith.constant 0 : index
    %c0_51 = arith.constant 0 : index
    %164 = vector.load %arg9[%c0_50, %c0_51] : memref<1x64xf32, #tpu.memory_space<vmem>>, vector<1x64xf32>
    %165 = vector.broadcast %164 : vector<1x64xf32> to vector<16x64xf32>
    %166 = arith.addf %163, %165 : vector<16x64xf32>
    %cst_52 = arith.constant 5.000000e-01 : f32
    %167 = vector.broadcast %cst_52 : f32 to vector<16x64xf32>
    %168 = arith.mulf %167, %166 : vector<16x64xf32>
    %cst_53 = arith.constant 0.707106769 : f32
    %169 = vector.broadcast %cst_53 : f32 to vector<16x64xf32>
    %170 = arith.mulf %166, %169 : vector<16x64xf32>
    %171 = math.erf %170 : vector<16x64xf32>
    %cst_54 = arith.constant 1.000000e+00 : f32
    %172 = vector.broadcast %cst_54 : f32 to vector<16x64xf32>
    %173 = arith.addf %172, %171 : vector<16x64xf32>
    %174 = arith.mulf %168, %173 : vector<16x64xf32>
    %175 = arith.truncf %174 : vector<16x64xf32> to vector<16x64xbf16>
    %c0_55 = arith.constant 0 : index
    %c0_56 = arith.constant 0 : index
    %176 = vector.load %arg10[%c0_55, %c0_56] : memref<64x32xbf16, #tpu.memory_space<vmem>>, vector<64x32xbf16>
    %cst_57 = arith.constant dense<0.000000e+00> : vector<16x32xf32>
    %177 = tpu.matmul %175, %176, %cst_57 {dimension_numbers = #tpu.dot_dimension_numbers<[1], [0], [0], [1], [0, 0, 1, 1], [], []>} : vector<16x64xbf16>, vector<64x32xbf16>, vector<16x32xf32> -> vector<16x32xf32>
    %c0_58 = arith.constant 0 : index
    %c0_59 = arith.constant 0 : index
    %178 = vector.load %arg11[%c0_58, %c0_59] : memref<1x32xf32, #tpu.memory_space<vmem>>, vector<1x32xf32>
    %179 = vector.broadcast %178 : vector<1x32xf32> to vector<16x32xf32>
    %180 = arith.addf %177, %179 : vector<16x32xf32>
    %181 = arith.addf %136, %180 : vector<16x32xf32>
    %182 = vector.shape_cast %181 : vector<16x32xf32> to vector<2x8x32xf32>
    %c0_60 = arith.constant 0 : index
    %c0_61 = arith.constant 0 : index
    %c0_62 = arith.constant 0 : index
    %183 = vector.load %arg12[%c0_60, %c0_61, %c0_62] : memref<2x8x32xf32, #tpu.memory_space<vmem>>, vector<2x8x32xf32>
    tpu.vector_store %arg12[%c0_60, %c0_61, %c0_62], %182 {strides = array<i32>} : memref<2x8x32xf32, #tpu.memory_space<vmem>>, vector<2x8x32xf32>,
    return
  }
}

</mosaic_0001>

<bundles_post_ra>
// kernel: transformer_forward.2
= control target key start
LH: loop header
LB: loop body
LE: loop exit
PB: predicated region body
PF: predicated region fallthrough
CT: control target
= control target key end

     0   :  { %17 = vsyncpa [#allocation3], 0  ;;  %s1560_s0 = inlined_call_operand.vmem [shape: f32[2,8,32], index: 0, kind: input, shape index: {}]   ;;  %s1561_s1 = inlined_call_operand.vmem [shape: f32[1,32], index: 1, kind: input, shape index: {}]   ;;  %s1562_s2 = inlined_call_operand.hbm [shape: f32[1,32], index: 2, kind: input, shape index: {}]   ;;  %s1563_s3 = inlined_call_operand.vmem [shape: bf16[32,96], index: 3, kind: input, shape index: {}]   ;;  %s1564_s4 = inlined_call_operand.hbm [shape: bf16[32,32], index: 4, kind: input, shape index: {}]   ;;  %s1565_s5 = inlined_call_operand.hbm [shape: f32[1,32], index: 5, kind: input, shape index: {}]   ;;  %s1566_s6 = inlined_call_operand.vmem [shape: f32[1,32], index: 6, kind: input, shape index: {}]   ;;  %s1567_s7 = inlined_call_operand.vmem [shape: f32[1,32], index: 7, kind: input, shape index: {}]   ;;  %s1568_s8 = inlined_call_operand.hbm [shape: bf16[32,64], index: 8, kind: input, shape index: {}]   ;;  %s1569_s9 = inlined_call_operand.vmem [shape: f32[1,64], index: 9, kind: input, shape index: {}]   ;;  %s1570_s10 = inlined_call_operand.vmem [shape: bf16[64,32], index: 10, kind: input, shape index: {}]   ;;  %s1571_s11 = inlined_call_operand.vmem [shape: f32[1,32], index: 11, kind: input, shape index: {}]   ;;  %s1572_s12 = inlined_call_operand.vmem [shape: f32[2,8,32], index: 12, kind: output, shape index: {}]  }
   0x1   :  { %18 = vsyncpa [#allocation5], 0  ;;  %s41_s23 = sshll.u32 %s1564_s4, 4  ;;  %s42_s23 = int_to_ptr.hbm [resolvable:$true] %s41_s23 }
   0x2   :  { %19 = vsyncpa [#allocation8], 0  ;;  %s1247_s24 = smov [#allocation4]   ;;  %s29_s28 = sshll.u32 %s1562_s2, 4  ;;  %s30_s28 = int_to_ptr.hbm [resolvable:$true] %s29_s28 }
   0x3   :  { %s43_s25 = sshll.u32 %s1247_s24, 4  ;;  %s1248_s29 = smov 64   ;;  %s44_s25 = int_to_ptr.vmem [resolvable:$true] %s43_s25 }
   0x4   :  { %s1249_s30 = smov 4   ;;  %s1250_s13 = smov [#allocation2]  }
   0x5   :  { %49 = dma.hbm_to_vmem [thread:$0]  %s42_s23, 256, %s44_s25, [#allocation5], %s1248_s29, %s1248_s29, %s1249_s30  }
   0x6   :  { %s31_s14 = sshll.u32 %s1250_s13, 4  ;;  %s55_s4 = sshll.u32 %s1565_s5, 4  ;;  %s32_s14 = int_to_ptr.vmem [resolvable:$true] %s31_s14  ;;  %s56_s4 = int_to_ptr.hbm [resolvable:$true] %s55_s4 }
   0x7   :  { %34 = dma.hbm_to_vmem [thread:$0]  %s30_s28, 16, %s32_s14, [#allocation3]  }
   0x8   :  { %s69_s19 = sshll.u32 %s1568_s8, 4  ;;  %s1251_s2 = smov [#allocation6]   ;;  %s70_s19 = int_to_ptr.hbm [resolvable:$true] %s69_s19 }
   0x9   :  { %s57_s20 = sshll.u32 %s1251_s2, 4  ;;  %s1252_s21 = smov [#allocation7]   ;;  %s58_s20 = int_to_ptr.vmem [resolvable:$true] %s57_s20 }
   0xa   :  { %60 = dma.hbm_to_vmem [thread:$0]  %s56_s4, 16, %s58_s20, [#allocation5]  }
   0xb   :  { %s71_s22 = sshll.u32 %s1252_s21, 4  ;;  %s72_s22 = int_to_ptr.vmem [resolvable:$true] %s71_s22 }
   0xc   :  { %77 = dma.hbm_to_vmem [thread:$0]  %s70_s19, 256, %s72_s22, [#allocation8], %s1248_s29, %s1248_s29, %s1249_s30  }
   0xd   :  { %1241 = dma.done.wait [#allocation3], 16  }
   0xe   :  { %1242 = vsyncadd [#allocation3], 4294967280 }
   0xf   :  { %1243 = dma.done.wait [#allocation5], 272  }
  0x10   :  { %1244 = vsyncadd [#allocation5], 4294967024 }
  0x11   :  { %1245 = dma.done.wait [#allocation8], 256  }
  0x12   :  { %1246 = vsyncadd [#allocation8], 4294967040  ;;  %vm105_vm0 = vcmask 261120   ;;  %v1351_v0 = vld [vmem:[%s1560_s0] sm:$0xff]  ;;  %v1358_v2 = vld [vmem:[%s1560_s0 + $0x8] sm:$0xff]  ;;  %v1253_v4 = vmov 32.0  }
  0x13   :  { %v106_v1 = vsel %vm105_vm0, %v1351_v0, 0.0  ;;  %v109_v3 = vsel %vm105_vm0, %v1358_v2, 0.0  ;;  %1099 = vrcp.f32 %v1253_v4  ;;  %v1048_v21 = vld [vmem:[%s1563_s3 + $0x8] sm:$0xff]  ;;  %v1047_v23 = vld [vmem:[%s1563_s3] sm:$0xff]  ;;  %s1254_s30 = smov 88   ;;  %s1256_s13 = smov 80  }
  0x14   :  { %107 = vadd.xlane.f32.xlu0 %v106_v1  ;;  %193 = vmatpush.bf16.msra.mxu0 %v1048_v21  ;;  %v1092_v42 = vld [vmem:[%s1561_s1] ss:$0 sm:$0xff]  ;;  %s1255_s1 = smov 96   ;;  %s1257_s14 = smov 72   ;;  %vm212_vm8 = vcmask 64512   ;;  %vm285_vm9 = vcmask 1043456  }
  0x15   :  { %v1093_v47 = vld [vmem:[#allocation2] ss:$0 sm:$0xff]  ;;  %s1258_s15 = smov 112   ;;  %s1259_s16 = smov 120   ;;  %vm691_vm10 = vcmask 130048   ;;  %vm694_vm11 = vcmask 195584  }
  0x16   :  { %s1260_s4 = smov 104   ;;  %s1261_s17 = smov 56  }
  0x17   :  { %s1263_s18 = smov 40   ;;  %s1264_s19 = smov 8  }
  0x18   :  { %194 = vmatpush.bf16.msra.mxu0 %v1047_v23  ;;  %s1265_s2 = smov 16   ;;  %s1266_s20 = smov 24  }
  0x19   :  { %v1100_v5 = vpop.eup %1099 }
  0x1a   :  { %v113_v6 = vmul.f32 32.0, %v1100_v5  ;;  %vm117_vm1 = vweird.f32 %v1100_v5 }
  0x1c   :  { %110 = vadd.xlane.f32.xlu0 %v109_v3  ;;  %v114_v7 = vsub.f32 1.0, %v113_v6 }
  0x1e   :  { %v115_v8 = vmul.f32 %v1100_v5, %v114_v7 }
  0x20   :  { %v116_v9 = vadd.f32 %v1100_v5, %v115_v8 }
  0x22   :  { %v1362_v10 = vsel %vm117_vm1, %v1100_v5, %v116_v9 }
  0x87   :  { %v108_v11 = vpop.xlane.xlu0 %107 }
  0x88   :  { %v119_v12 = vmul.f32 %v1362_v10, %v108_v11 }
  0x8a   :  { %v121_v13 = vsub.f32 %v1351_v0, %v119_v12 }
  0x8c   :  { %v123_v14 = vmul.f32 %v121_v13, %v121_v13 }
  0x8e   :  { %v125_v15 = vsel %vm105_vm0, %v123_v14, 0.0 }
  0x8f   :  { %126 = vadd.xlane.f32.xlu1 %v125_v15  ;;  %v111_v16 = vpop.xlane.xlu0 %110 }
  0x90   :  { %v120_v17 = vmul.f32 %v1362_v10, %v111_v16 }
  0x92   :  { %v122_v18 = vsub.f32 %v1358_v2, %v120_v17 }
  0x94   :  { %v124_v19 = vmul.f32 %v122_v18, %v122_v18 }
  0x96   :  { %v128_v20 = vsel %vm105_vm0, %v124_v19, 0.0 }
  0x97   :  { %129 = vadd.xlane.f32.xlu1 %v128_v20 }
 0x102   :  { %v127_v22 = vpop.xlane.xlu1 %126 }
 0x103   :  { %v131_v24 = vmul.f32 %v127_v22, %v1362_v10 }
 0x105   :  { %v133_v25 = vadd.f32 1e-05, %v131_v24 }
 0x107   :  { %1101 = vrsqrt.f32 %v133_v25  ;;  %vm141_vm3 = vweird.f32 %v133_v25 }
 0x10a   :  { %v130_v26 = vpop.xlane.xlu1 %129 }
 0x10b   :  { %v132_v27 = vmul.f32 %v130_v26, %v1362_v10 }
 0x10d   :  { %v1102_v28 = vpop.eup %1101  ;;  %v134_v29 = vadd.f32 1e-05, %v132_v27 }
 0x10e   :  { %v136_v30 = vmul.f32 %v1102_v28, %v133_v25  ;;  %vm142_vm2 = vweird.f32 %v1102_v28 }
 0x10f   :  { %1103 = vrsqrt.f32 %v134_v29  ;;  %vm143_vm4 = vmor %vm141_vm3, %vm142_vm2  ;;  %vm151_vm6 = vweird.f32 %v134_v29 }
 0x110   :  { %v137_v31 = vmul.f32 %v1102_v28, %v136_v30 }
 0x112   :  { %v138_v32 = vmul.f32 0.5, %v137_v31 }
 0x114   :  { %v139_v33 = vsub.f32 1.5, %v138_v32 }
 0x115   :  { %v1104_v34 = vpop.eup %1103 }
 0x116   :  { %v140_v35 = vmul.f32 %v1102_v28, %v139_v33  ;;  %v146_v36 = vmul.f32 %v1104_v34, %v134_v29  ;;  %vm152_vm5 = vweird.f32 %v1104_v34 }
 0x117   :  { %vm153_vm7 = vmor %vm151_vm6, %vm152_vm5 }
 0x118   :  { %v147_v37 = vmul.f32 %v1104_v34, %v146_v36  ;;  %v144_v38 = vsel %vm143_vm4, %v1102_v28, %v140_v35 }
 0x119   :  { %v155_v41 = vmul.f32 %v144_v38, %v121_v13 }
 0x11a   :  { %v148_v39 = vmul.f32 0.5, %v147_v37 }
 0x11b   :  { %v160_v46 = vmul.f32 %v1092_v42, %v155_v41 }
 0x11c   :  { %v149_v40 = vsub.f32 1.5, %v148_v39 }
 0x11d   :  { %v165_v49 = vadd.f32 %v1093_v47, %v160_v46 }
 0x11e   :  { %v150_v43 = vmul.f32 %v1104_v34, %v149_v40 }
 0x120   :  { %v154_v44 = vsel %vm153_vm7, %v1104_v34, %v150_v43 }
 0x121   :  { %v156_v45 = vmul.f32 %v154_v44, %v122_v18 }
 0x123   :  { %v161_v48 = vmul.f32 %v1092_v42, %v156_v45 }
 0x125   :  { %v166_v50 = vadd.f32 %v1093_v47, %v161_v48 }
 0x127   :  { %v167_v51 = vpack.c.bf16 %v166_v50, %v165_v49 }
 0x129   :  { %993 = vmatmul.msk.bf16.vlgmr.msra.gmra.mxu0 %vm105_vm0, %v167_v51 }
 0x1a6   :  { %v196_v52 = vpop.f32.mrf.mxu0 }
 0x1a7   :  { %v205_v53 = vpack.c.bf16 %v196_v52, %v196_v52  ;;  %v201_v59 = vmul.f32 0.35355338, %v196_v52 }
 0x1a9   :  { %v208_v54 = vunpack.c.l.b16 %v205_v53  ;;  %v203_v63 = vpack.c.bf16 %v201_v59, %v201_v59 }
 0x1ab   :  { %v1382_v55 = vpack.c.b16 %v208_v54, %v208_v54  ;;  %v324_v3 = vunpack.c.l.b16 %v203_v63 }
 0x1ad   :  { %328 = vrot.lane.b32.xlu0 %v1382_v55, %s1254_s30  ;;  %210 = vrot.lane.b32.xlu2 %v1382_v55, %s1255_s1  ;;  %v325_v5 = vpack.c.b16 %v324_v3, %v324_v3 }
 0x1ae   :  { %v198_v56 = vpop.f32.mrf.mxu0 }
 0x1af   :  { %v202_v57 = vmul.f32 0.35355338, %v198_v56  ;;  %v206_v58 = vpack.c.bf16 %v198_v56, %v198_v56 }
 0x1b1   :  { %v233_v60 = vunpack.c.l.b16 %v206_v58  ;;  %v204_v61 = vpack.c.bf16 %v202_v57, %v202_v57 }
 0x1b3   :  { %v1386_v62 = vpack.c.b16 %v233_v60, %v233_v60  ;;  %v350_v1 = vunpack.c.l.b16 %v204_v61 }
 0x1b5   :  { %466 = vrot.lane.b32.xlu0 %v1386_v62, %s1256_s13  ;;  %354 = vrot.lane.b32.xlu1 %v1386_v62, %s1254_s30  ;;  %v351_v4 = vpack.c.b16 %v350_v1, %v350_v1 }
 0x1b6   :  { %235 = vrot.lane.b32.xlu2 %v1386_v62, %s1255_s1 }
 0x1bd   :  { %555 = vrot.lane.b32.xlu0 %v1382_v55, %s1257_s14  ;;  %464 = vrot.lane.b32.xlu1 %v351_v4, %s1258_s15 }
 0x1be   :  { %326 = vrot.lane.b32.xlu2 %v325_v5, %s1259_s16 }
 0x1c5   :  { %576 = vrot.lane.b32.xlu0 %v351_v4, %s1260_s4  ;;  %553 = vrot.lane.b32.xlu1 %v325_v5, %s1260_s4 }
 0x1c6   :  { %352 = vrot.lane.b32.xlu2 %v351_v4, %s1259_s16 }
 0x1ce   :  { %443 = vrot.lane.b32.xlu2 %v1382_v55, %s1256_s13 }
 0x1d6   :  { %441 = vrot.lane.b32.xlu2 %v325_v5, %s1258_s15 }
 0x1de   :  { %578 = vrot.lane.b32.xlu2 %v1386_v62, %s1257_s14 }
 0x207   :  { %v211_v6 = vpop.permute.xlu2 %210 }
 0x208   :  { %v217_v7 = vsel %vm212_vm8, %v211_v6, 0 }
 0x209   :  { %226 = vmatpush.bf16.xpose.msra.mxu1 %v217_v7 }
 0x210   :  { %v236_v8 = vpop.permute.xlu2 %235  ;;  %994 = vmatmul.msk.bf16.vlgmr.msra.gmra.mxu1 %vm212_vm8, %v203_v63 }
 0x211   :  { %v241_v9 = vsel %vm212_vm8, %v236_v8, 0 }
 0x212   :  { %250 = vmatpush.bf16.xpose.msra.mxu2 %v241_v9 }
 0x218   :  { %v327_v11 = vpop.permute.xlu2 %326 }
 0x219   :  { %995 = vmatmul.msk.bf16.vlgmr.msra.gmra.mxu2 %vm212_vm8, %v204_v61 }
 0x21f   :  { %v329_v12 = vpop.permute.xlu0 %328 }
 0x220   :  { %v353_v13 = vpop.permute.xlu2 %352  ;;  %v334_v14 = vsel %vm212_vm8, %v329_v12, 0 }
 0x221   :  { %343 = vmatpush.bf16.xpose.msrb.mxu0 %v334_v14 }
 0x227   :  { %v467_v15 = vpop.permute.xlu0 %466  ;;  %v355_v16 = vpop.permute.xlu1 %354 }
 0x228   :  { %v472_v17 = vsel %vm212_vm8, %v467_v15, 0  ;;  %v444_v18 = vpop.permute.xlu2 %443  ;;  %998 = vmatmul.msk.bf16.vlgmr.msrb.gmra.mxu0 %vm212_vm8, %v327_v11  ;;  %v360_v19 = vsel %vm212_vm8, %v355_v16, 0 }
 0x229   :  { %v449_v20 = vsel %vm212_vm8, %v444_v18, 0  ;;  %369 = vmatpush.bf16.xpose.msrb.mxu1 %v360_v19 }
 0x22a   :  { %458 = vmatpush.bf16.xpose.msra.mxu0 %v449_v20 }
 0x22f   :  { %v556_v21 = vpop.permute.xlu0 %555  ;;  %v465_v26 = vpop.permute.xlu1 %464 }
 0x230   :  { %v561_v22 = vsel %vm212_vm8, %v556_v21, 0  ;;  %v442_v23 = vpop.permute.xlu2 %441  ;;  %999 = vmatmul.msk.bf16.vlgmr.msrb.gmra.mxu1 %vm212_vm8, %v353_v13 }
 0x231   :  { %481 = vmatpush.bf16.xpose.msra.mxu1 %v472_v17 }
 0x232   :  { %570 = vmatpush.bf16.xpose.msrb.mxu0 %v561_v22 }
 0x237   :  { %v554_v27 = vpop.permute.xlu1 %553  ;;  %v577_v28 = vpop.permute.xlu0 %576 }
 0x238   :  { %v579_v24 = vpop.permute.xlu2 %578  ;;  %1002 = vmatmul.msk.bf16.vlgmr.msra.gmra.mxu0 %vm212_vm8, %v442_v23 }
 0x239   :  { %v584_v25 = vsel %vm212_vm8, %v579_v24, 0 }
 0x23a   :  { %593 = vmatpush.bf16.xpose.msrb.mxu1 %v584_v25 }
 0x240   :  { %1003 = vmatmul.msk.bf16.vlgmr.msra.gmra.mxu1 %vm212_vm8, %v465_v26 }
 0x248   :  { %1006 = vmatmul.msk.bf16.vlgmr.msrb.gmra.mxu0 %vm212_vm8, %v554_v27 }
 0x250   :  { %1007 = vmatmul.msk.bf16.vlgmr.msrb.gmra.mxu1 %vm212_vm8, %v577_v28 }
 0x28d   :  { %v228_v29 = vpop.f32.mrf.mxu1 }
 0x28e   :  { %v256_v30 = vsel %vm212_vm8, %v228_v29, -inf }
 0x28f   :  { %257 = vmax.xlane.f32.xlu2 %v256_v30 }
 0x295   :  { %v230_v31 = vpop.f32.mrf.mxu1 }
 0x29c   :  { %v252_v32 = vpop.f32.mrf.mxu2 }
 0x29d   :  { %v259_v33 = vsel %vm212_vm8, %v252_v32, -inf }
 0x29e   :  { %260 = vmax.xlane.f32.xlu1 %v259_v33 }
 0x2a4   :  { %v254_v34 = vpop.f32.mrf.mxu2 }
 0x2a5   :  { %v345_v35 = vpop.f32.mrf.mxu0 }
 0x2a6   :  { %v375_v36 = vsel %vm212_vm8, %v345_v35, -inf }
 0x2a7   :  { %376 = vmax.xlane.f32.xlu0 %v375_v36  ;;  %302 = vrot.lane.b32.xlu2 %v1386_v62, %s1248_s29 }
 0x2ad   :  { %v347_v37 = vpop.f32.mrf.mxu0  ;;  %v371_v38 = vpop.f32.mrf.mxu1 }
 0x2ae   :  { %v378_v48 = vsel %vm212_vm8, %v371_v38, -inf }
 0x2af   :  { %420 = vrot.lane.b32.xlu2 %v1386_v62, %s1261_s17 }
 0x2b5   :  { %v373_v39 = vpop.f32.mrf.mxu1  ;;  %v460_v40 = vpop.f32.mrf.mxu0 }
 0x2b6   :  { %v487_v50 = vsel %vm212_vm8, %v460_v40, -inf }
 0x2b7   :  { %280 = vrot.lane.b32.xlu1 %v1382_v55, %s1248_s29  ;;  %s1262_s29 = smov 48  }
 0x2bb   :  { %399 = vrot.lane.b32.xlu0 %v1382_v55, %s1261_s17 }
 0x2bd   :  { %v462_v41 = vpop.f32.mrf.mxu0  ;;  %v1419_v42 = vpop.f32.mrf.mxu1 }
 0x2be   :  { %v490_v51 = vsel %vm212_vm8, %v1419_v42, -inf }
 0x2c5   :  { %v485_v43 = vpop.f32.mrf.mxu1  ;;  %v1421_v44 = vpop.f32.mrf.mxu0 }
 0x2c6   :  { %v599_v52 = vsel %vm212_vm8, %v1421_v44, -inf }
 0x2cd   :  { %v574_v45 = vpop.f32.mrf.mxu0  ;;  %v1423_v46 = vpop.f32.mrf.mxu1 }
 0x2ce   :  { %v602_v49 = vsel %vm212_vm8, %v1423_v46, -inf }
 0x2d5   :  { %v597_v47 = vpop.f32.mrf.mxu1 }
 0x2d8   :  { %379 = vmax.xlane.f32.xlu2 %v378_v48 }
 0x2e0   :  { %603 = vmax.xlane.f32.xlu2 %v602_v49 }
 0x2e1   :  { %488 = vmax.xlane.f32.xlu1 %v487_v50 }
 0x2e5   :  { %491 = vmax.xlane.f32.xlu0 %v490_v51 }
 0x2ed   :  { %600 = vmax.xlane.f32.xlu0 %v599_v52 }
 0x302   :  { %v258_v53 = vpop.xlane.xlu2 %257 }
 0x303   :  { %v262_v54 = vsub.f32 %v228_v29, %v258_v53 }
 0x305   :  { %v264_v56 = vmul.f32 1.442695, %v262_v54 }
 0x307   :  { %1105 = vpow2.f32 %v264_v56 }
 0x30a   :  { %v303_v6 = vpop.permute.xlu2 %302 }
 0x30b   :  { %v308_v11 = vsel %vm285_vm9, %v303_v6, 0 }
 0x30d   :  { %v1433_v57 = vpop.eup %1105 }
 0x30e   :  { %v268_v58 = vsel %vm212_vm8, %v1433_v57, 0.0 }
 0x30f   :  { %269 = vadd.xlane.f32.xlu2 %v268_v58 }
 0x311   :  { %v261_v59 = vpop.xlane.xlu1 %260 }
 0x312   :  { %v263_v63 = vsub.f32 %v252_v32, %v261_v59  ;;  %v421_v15 = vpop.permute.xlu2 %420 }
 0x313   :  { %v426_v43 = vsel %vm285_vm9, %v421_v15, 0 }
 0x314   :  { %v266_v3 = vmul.f32 1.442695, %v263_v63 }
 0x31a   :  { %v377_v60 = vpop.xlane.xlu0 %376 }
 0x31b   :  { %v381_v61 = vsub.f32 %v345_v35, %v377_v60 }
 0x31d   :  { %v383_v1 = vmul.f32 1.442695, %v381_v61 }
 0x31f   :  { %1107 = vpow2.f32 %v383_v1 }
 0x320   :  { %1109 = vpow2.f32 %v266_v3 }
 0x325   :  { %v1437_v4 = vpop.eup %1107 }
 0x326   :  { %v387_v5 = vsel %vm212_vm8, %v1437_v4, 0.0  ;;  %v1444_v9 = vpop.eup %1109 }
 0x327   :  { %388 = vadd.xlane.f32.xlu0 %v387_v5  ;;  %532 = vrot.lane.b32.xlu2 %v1386_v62, %s1262_s29  ;;  %v271_v14 = vsel %vm212_vm8, %v1444_v9, 0.0 }
 0x329   :  { %v281_v7 = vpop.permute.xlu1 %280 }
 0x32a   :  { %v287_v8 = vsel %vm285_vm9, %v281_v7, 0 }
 0x32b   :  { %296 = vmatpush.bf16.msra.mxu3 %v287_v8 }
 0x32d   :  { %v400_v12 = vpop.permute.xlu0 %399 }
 0x32e   :  { %v405_v13 = vsel %vm285_vm9, %v400_v12, 0 }
 0x32f   :  { %317 = vmatpush.bf16.msrb.mxu3 %v308_v11  ;;  %414 = vmatpush.bf16.msrb.mxu2 %v405_v13 }
 0x330   :  { %272 = vadd.xlane.f32.xlu0 %v271_v14 }
 0x34b   :  { %v380_v16 = vpop.xlane.xlu2 %379 }
 0x34c   :  { %v382_v17 = vsub.f32 %v371_v38, %v380_v16 }
 0x34e   :  { %v385_v18 = vmul.f32 1.442695, %v382_v17 }
 0x350   :  { %1111 = vpow2.f32 %v385_v18 }
 0x353   :  { %v604_v36 = vpop.xlane.xlu2 %603 }
 0x354   :  { %v489_v19 = vpop.xlane.xlu1 %488  ;;  %v606_v39 = vsub.f32 %v1423_v46, %v604_v36 }
 0x355   :  { %v493_v20 = vsub.f32 %v460_v40, %v489_v19 }
 0x356   :  { %v1112_v21 = vpop.eup %1111 }
 0x357   :  { %v495_v22 = vmul.f32 1.442695, %v493_v20  ;;  %v390_v23 = vsel %vm212_vm8, %v1112_v21, 0.0 }
 0x358   :  { %v492_v24 = vpop.xlane.xlu0 %491  ;;  %391 = vadd.xlane.f32.xlu1 %v390_v23 }
 0x359   :  { %1113 = vpow2.f32 %v495_v22  ;;  %v494_v25 = vsub.f32 %v1419_v42, %v492_v24  ;;  %v609_v42 = vmul.f32 1.442695, %v606_v39 }
 0x35b   :  { %v497_v26 = vmul.f32 1.442695, %v494_v25 }
 0x35d   :  { %1115 = vpow2.f32 %v497_v26 }
 0x35f   :  { %v1452_v27 = vpop.eup %1113 }
 0x360   :  { %v601_v28 = vpop.xlane.xlu0 %600  ;;  %v499_v29 = vsel %vm212_vm8, %v1452_v27, 0.0 }
 0x361   :  { %v605_v30 = vsub.f32 %v1421_v44, %v601_v28  ;;  %500 = vadd.xlane.f32.xlu2 %v499_v29 }
 0x363   :  { %v1116_v31 = vpop.eup %1115  ;;  %v607_v32 = vmul.f32 1.442695, %v605_v30 }
 0x364   :  { %v502_v33 = vsel %vm212_vm8, %v1116_v31, 0.0 }
 0x365   :  { %1117 = vpow2.f32 %v607_v32  ;;  %503 = vadd.xlane.f32.xlu0 %v502_v33 }
 0x36b   :  { %v1458_v34 = vpop.eup %1117 }
 0x36c   :  { %v611_v35 = vsel %vm212_vm8, %v1458_v34, 0.0 }
 0x36d   :  { %612 = vadd.xlane.f32.xlu0 %v611_v35 }
 0x371   :  { %511 = vrot.lane.b32.xlu1 %v1382_v55, %s1262_s29 }
 0x379   :  { %644 = vrot.lane.b32.xlu2 %v1386_v62, %s1263_s18 }
 0x381   :  { %623 = vrot.lane.b32.xlu0 %v1382_v55, %s1263_s18 }
 0x382   :  { %v270_v37 = vpop.xlane.xlu2 %269 }
 0x383   :  { %1119 = vrcp.f32 %v270_v37 }
 0x384   :  { %1121 = vpow2.f32 %v609_v42 }
 0x389   :  { %v1120_v38 = vpop.eup %1119 }
 0x38a   :  { %v276_v40 = vmul.f32 %v1120_v38, %v1433_v57  ;;  %v1122_v44 = vpop.eup %1121  ;;  %v533_v51 = vpop.permute.xlu2 %532 }
 0x38b   :  { %v614_v45 = vsel %vm212_vm8, %v1122_v44, 0.0  ;;  %v538_v53 = vsel %vm285_vm9, %v533_v51, 0 }
 0x38c   :  { %v278_v41 = vpack.c.bf16 %v276_v40, %v276_v40  ;;  %v1050_v40 = vld [vmem:[#allocation4 + $0x8] sm:$0xff] }
 0x38d   :  { %727 = vmatpush.bf16.msra.mxu0 %v1050_v40 }
 0x38e   :  { %996 = vmatmul.msk.bf16.vlgmr.msra.gmra.mxu3 %vm212_vm8, %v278_v41  ;;  %v1049_v41 = vld [vmem:[#allocation4] sm:$0xff] }
 0x38f   :  { %435 = vmatpush.bf16.msra.mxu3 %v426_v43 }
 0x391   :  { %728 = vmatpush.bf16.msra.mxu0 %v1049_v41 }
 0x39a   :  { %v389_v62 = vpop.xlane.xlu0 %388 }
 0x39b   :  { %1123 = vrcp.f32 %v389_v62  ;;  %615 = vadd.xlane.f32.xlu1 %v614_v45 }
 0x3a1   :  { %v1124_v55 = vpop.eup %1123 }
 0x3a2   :  { %v395_v47 = vmul.f32 %v1124_v55, %v1437_v4 }
 0x3a3   :  { %v273_v46 = vpop.xlane.xlu0 %272 }
 0x3a4   :  { %1125 = vrcp.f32 %v273_v46  ;;  %v397_v48 = vpack.c.bf16 %v395_v47, %v395_v47 }
 0x3a6   :  { %1000 = vmatmul.msk.bf16.vlgmr.msrb.gmra.mxu2 %vm212_vm8, %v397_v48 }
 0x3aa   :  { %v1126_v49 = vpop.eup %1125 }
 0x3ab   :  { %v277_v50 = vmul.f32 %v1126_v49, %v1444_v9 }
 0x3ad   :  { %v279_v52 = vpack.c.bf16 %v277_v50, %v277_v50 }
 0x3af   :  { %997 = vmatmul.msk.bf16.vlgmr.msrb.gmra.mxu3 %vm212_vm8, %v279_v52 }
 0x3b0   :  { %547 = vmatpush.bf16.msrb.mxu3 %v538_v53 }
 0x3cb   :  { %v392_v54 = vpop.xlane.xlu1 %391 }
 0x3cc   :  { %1127 = vrcp.f32 %v392_v54 }
 0x3d2   :  { %v1128_v56 = vpop.eup %1127 }
 0x3d3   :  { %v396_v57 = vmul.f32 %v1128_v56, %v1112_v21 }
 0x3d4   :  { %v501_v58 = vpop.xlane.xlu2 %500 }
 0x3d5   :  { %v398_v59 = vpack.c.bf16 %v396_v57, %v396_v57  ;;  %1129 = vrcp.f32 %v501_v58  ;;  %v1094_v57 = vld [vmem:[#allocation6] ss:$0 sm:$0xff] }
 0x3d7   :  { %1001 = vmatmul.msk.bf16.vlgmr.msra.gmra.mxu3 %vm212_vm8, %v398_v59 }
 0x3d8   :  { %v504_v60 = vpop.xlane.xlu0 %503 }
 0x3d9   :  { %1131 = vrcp.f32 %v504_v60 }
 0x3db   :  { %v1130_v1 = vpop.eup %1129 }
 0x3dc   :  { %v645_v61 = vpop.permute.xlu2 %644  ;;  %v507_v5 = vmul.f32 %v1130_v1, %v1452_v27 }
 0x3dd   :  { %v650_v63 = vsel %vm285_vm9, %v645_v61, 0 }
 0x3de   :  { %659 = vmatpush.bf16.msra.mxu3 %v650_v63  ;;  %v509_v9 = vpack.c.bf16 %v507_v5, %v507_v5 }
 0x3df   :  { %v1132_v3 = vpop.eup %1131 }
 0x3e0   :  { %v508_v4 = vmul.f32 %v1132_v3, %v1116_v31  ;;  %v613_v11 = vpop.xlane.xlu0 %612 }
 0x3e1   :  { %1133 = vrcp.f32 %v613_v11 }
 0x3e2   :  { %v510_v8 = vpack.c.bf16 %v508_v4, %v508_v4 }
 0x3e3   :  { %v512_v6 = vpop.permute.xlu1 %511 }
 0x3e4   :  { %v517_v7 = vsel %vm285_vm9, %v512_v6, 0 }
 0x3e5   :  { %526 = vmatpush.bf16.msra.mxu2 %v517_v7 }
 0x3e7   :  { %1005 = vmatmul.msk.bf16.vlgmr.msrb.gmra.mxu3 %vm212_vm8, %v510_v8  ;;  %v1134_v12 = vpop.eup %1133 }
 0x3e8   :  { %1004 = vmatmul.msk.bf16.vlgmr.msra.gmra.mxu2 %vm212_vm8, %v509_v9  ;;  %v619_v13 = vmul.f32 %v1134_v12, %v1458_v34 }
 0x3ea   :  { %v621_v16 = vpack.c.bf16 %v619_v13, %v619_v13 }
 0x3f3   :  { %v624_v14 = vpop.permute.xlu0 %623 }
 0x3f4   :  { %v629_v15 = vsel %vm285_vm9, %v624_v14, 0  ;;  %v1052_v14 = vld [vmem:[#allocation7 + $0x8] sm:$0xff] }
 0x3f5   :  { %638 = vmatpush.bf16.msrb.mxu2 %v629_v15  ;;  %823 = vmatpush.bf16.msra.mxu1 %v1052_v14 }
 0x3f8   :  { %1008 = vmatmul.msk.bf16.vlgmr.msrb.gmra.mxu2 %vm212_vm8, %v621_v16 }
 0x40e   :  { %v616_v17 = vpop.xlane.xlu1 %615 }
 0x40f   :  { %1135 = vrcp.f32 %v616_v17 }
 0x411   :  { %v298_v18 = vpop.f32.mrf.mxu3 }
 0x415   :  { %v1136_v19 = vpop.eup %1135 }
 0x416   :  { %v620_v20 = vmul.f32 %v1136_v19, %v1122_v44 }
 0x418   :  { %v622_v21 = vpack.c.bf16 %v620_v20, %v620_v20 }
 0x419   :  { %v300_v22 = vpop.f32.mrf.mxu3 }
 0x41a   :  { %1009 = vmatmul.msk.bf16.vlgmr.msra.gmra.mxu3 %vm212_vm8, %v622_v21 }
 0x429   :  { %v416_v23 = vpop.f32.mrf.mxu2 }
 0x431   :  { %v418_v25 = vpop.f32.mrf.mxu2 }
 0x432   :  { %v319_v24 = vpop.f32.mrf.mxu3 }
 0x43a   :  { %v321_v26 = vpop.f32.mrf.mxu3 }
 0x45a   :  { %v437_v27 = vpop.f32.mrf.mxu3 }
 0x45b   :  { %v1077_v28 = vpack.i.bf16 %v437_v27, %v416_v23 }
 0x45d   :  { %1078 = vrot.lane.b32.xlu0 %v1077_v28, %s1264_s19 }
 0x462   :  { %v439_v29 = vpop.f32.mrf.mxu3 }
 0x46a   :  { %v549_v30 = vpop.f32.mrf.mxu3 }
 0x46b   :  { %v528_v31 = vpop.f32.mrf.mxu2 }
 0x46c   :  { %v1082_v32 = vpack.i.bf16 %v549_v30, %v528_v31 }
 0x46e   :  { %1083 = vrot.lane.b32.xlu2 %v1082_v32, %s1265_s2 }
 0x472   :  { %v551_v33 = vpop.f32.mrf.mxu3 }
 0x473   :  { %v530_v34 = vpop.f32.mrf.mxu2 }
 0x47b   :  { %v640_v35 = vpop.f32.mrf.mxu2 }
 0x483   :  { %v642_v36 = vpop.f32.mrf.mxu2 }
 0x49d   :  { %v661_v37 = vpop.f32.mrf.mxu3 }
 0x49e   :  { %v1087_v38 = vpack.i.bf16 %v661_v37, %v640_v35  ;;  %v1096_v37 = vld [vmem:[%s1567_s7] ss:$0 sm:$0xff] }
 0x4a0   :  { %1088 = vrot.lane.b32.xlu0 %v1087_v38, %s1266_s20 }
 0x4a5   :  { %v663_v39 = vpop.f32.mrf.mxu3 }
 0x4c8   :  { %v1084_v62 = vpop.permute.xlu2 %1083 }
 0x4c9   :  { %v1086_v47 = vunpack.i.h.bf16 %v1084_v62  ;;  %v1085_v46 = vunpack.i.l.bf16 %v1084_v62 }
 0x4cf   :  { %v1079_v42 = vpop.permute.xlu0 %1078 }
 0x4d0   :  { %v1081_v43 = vunpack.i.h.bf16 %v1079_v42  ;;  %v1080_v44 = vunpack.i.l.bf16 %v1079_v42 }
 0x4d2   :  { %v690_v45 = vsel %vm212_vm8, %v319_v24, %v1081_v43  ;;  %v689_v55 = vsel %vm212_vm8, %v298_v18, %v1080_v44  ;;  %v1051_v18 = vld [vmem:[#allocation7] sm:$0xff]  ;;  %v1097_v44 = vld [vmem:[%s1569_s9] ss:$0 sm:$0xff] }
 0x4d3   :  { %v692_v51 = vsel %vm691_vm10, %v689_v55, %v1085_v46  ;;  %v693_v52 = vsel %vm691_vm10, %v690_v45, %v1086_v47  ;;  %824 = vmatpush.bf16.msra.mxu1 %v1051_v18  ;;  %v1054_v18 = vld [vmem:[%s1570_s10 + $0x8] sm:$0xff] }
 0x512   :  { %v1089_v48 = vpop.permute.xlu0 %1088 }
 0x513   :  { %v1091_v49 = vunpack.i.h.bf16 %v1089_v48  ;;  %v1090_v50 = vunpack.i.l.bf16 %v1089_v48 }
 0x515   :  { %v696_v53 = vsel %vm694_vm11, %v693_v52, %v1091_v49  ;;  %v695_v54 = vsel %vm694_vm11, %v692_v51, %v1090_v50  ;;  %vm956_vm11 = vcmask 523264  }
 0x516   :  { %v697_v56 = vpack.c.bf16 %v696_v53, %v695_v54 }
 0x518   :  { %1018 = vmatmul.msk.bf16.vlgmr.msra.gmra.mxu0 %vm105_vm0, %v697_v56 }
 0x595   :  { %v730_v58 = vpop.f32.mrf.mxu0 }
 0x596   :  { %v731_v59 = vadd.f32 %v1094_v57, %v730_v58 }
 0x598   :  { %v1490_v60 = vadd.f32 %v731_v59, %v1351_v0 }
 0x59a   :  { %v739_v61 = vsel %vm105_vm0, %v1490_v60, 0.0 }
 0x59b   :  { %740 = vadd.xlane.f32.xlu2 %v739_v61 }
 0x59d   :  { %v732_v63 = vpop.f32.mrf.mxu0 }
 0x59e   :  { %v733_v1 = vadd.f32 %v1094_v57, %v732_v63 }
 0x5a0   :  { %v1495_v3 = vadd.f32 %v733_v1, %v1358_v2  ;;  %v1056_v1 = vld [vmem:[%s1570_s10 + $0x18] sm:$0xff] }
 0x5a1   :  { %964 = vmatpush.bf16.msra.mxu2 %v1056_v1 }
 0x5a2   :  { %v742_v4 = vsel %vm105_vm0, %v1495_v3, 0.0 }
 0x5a3   :  { %743 = vadd.xlane.f32.xlu0 %v742_v4 }
 0x60e   :  { %v741_v5 = vpop.xlane.xlu2 %740 }
 0x60f   :  { %v745_v6 = vmul.f32 %v741_v5, %v1362_v10 }
 0x611   :  { %v747_v7 = vsub.f32 %v1490_v60, %v745_v6 }
 0x613   :  { %v749_v0 = vmul.f32 %v747_v7, %v747_v7 }
 0x615   :  { %v751_v8 = vsel %vm105_vm0, %v749_v0, 0.0 }
 0x616   :  { %v744_v9 = vpop.xlane.xlu0 %743  ;;  %752 = vadd.xlane.f32.xlu1 %v751_v8 }
 0x617   :  { %v746_v11 = vmul.f32 %v744_v9, %v1362_v10 }
 0x619   :  { %v748_v12 = vsub.f32 %v1495_v3, %v746_v11  ;;  %v1055_v11 = vld [vmem:[%s1570_s10 + $0x10] sm:$0xff] }
 0x61a   :  { %965 = vmatpush.bf16.msra.mxu2 %v1055_v11 }
 0x61b   :  { %v750_v2 = vmul.f32 %v748_v12, %v748_v12 }
 0x61d   :  { %v754_v13 = vsel %vm105_vm0, %v750_v2, 0.0 }
 0x61e   :  { %755 = vadd.xlane.f32.xlu1 %v754_v13  ;;  %966 = vmatpush.bf16.msra.mxu2 %v1054_v18 }
 0x689   :  { %v753_v15 = vpop.xlane.xlu1 %752 }
 0x68a   :  { %v757_v16 = vmul.f32 %v753_v15, %v1362_v10 }
 0x68c   :  { %v759_v17 = vadd.f32 1e-05, %v757_v16 }
 0x68e   :  { %1137 = vrsqrt.f32 %v759_v17  ;;  %vm767_vm13 = vweird.f32 %v759_v17 }
 0x691   :  { %v756_v19 = vpop.xlane.xlu1 %755 }
 0x692   :  { %v758_v20 = vmul.f32 %v756_v19, %v1362_v10  ;;  %v1095_v10 = vld [vmem:[%s1566_s6] ss:$0 sm:$0xff] }
 0x694   :  { %v1138_v21 = vpop.eup %1137  ;;  %v760_v22 = vadd.f32 1e-05, %v758_v20 }
 0x695   :  { %v762_v23 = vmul.f32 %v1138_v21, %v759_v17  ;;  %vm768_vm12 = vweird.f32 %v1138_v21 }
 0x696   :  { %1139 = vrsqrt.f32 %v760_v22  ;;  %vm769_vm14 = vmor %vm767_vm13, %vm768_vm12  ;;  %vm777_vm1 = vweird.f32 %v760_v22 }
 0x697   :  { %v763_v24 = vmul.f32 %v1138_v21, %v762_v23 }
 0x699   :  { %v764_v25 = vmul.f32 0.5, %v763_v24  ;;  %v1053_v24 = vld [vmem:[%s1570_s10] sm:$0xff] }
 0x69a   :  { %967 = vmatpush.bf16.msra.mxu2 %v1053_v24 }
 0x69b   :  { %v765_v26 = vsub.f32 1.5, %v764_v25 }
 0x69c   :  { %v1140_v27 = vpop.eup %1139 }
 0x69d   :  { %v766_v28 = vmul.f32 %v1138_v21, %v765_v26  ;;  %v772_v29 = vmul.f32 %v1140_v27, %v760_v22  ;;  %vm778_vm15 = vweird.f32 %v1140_v27 }
 0x69e   :  { %vm779_vm2 = vmor %vm777_vm1, %vm778_vm15 }
 0x69f   :  { %v773_v30 = vmul.f32 %v1140_v27, %v772_v29  ;;  %v770_v31 = vsel %vm769_vm14, %v1138_v21, %v766_v28 }
 0x6a0   :  { %v781_v34 = vmul.f32 %v770_v31, %v747_v7 }
 0x6a1   :  { %v774_v32 = vmul.f32 0.5, %v773_v30 }
 0x6a2   :  { %v786_v38 = vmul.f32 %v1095_v10, %v781_v34 }
 0x6a3   :  { %v775_v33 = vsub.f32 1.5, %v774_v32 }
 0x6a4   :  { %v791_v41 = vadd.f32 %v1096_v37, %v786_v38 }
 0x6a5   :  { %v776_v35 = vmul.f32 %v1140_v27, %v775_v33 }
 0x6a7   :  { %v780_v36 = vsel %vm779_vm2, %v1140_v27, %v776_v35 }
 0x6a8   :  { %v782_v39 = vmul.f32 %v780_v36, %v748_v12 }
 0x6aa   :  { %v787_v40 = vmul.f32 %v1095_v10, %v782_v39 }
 0x6ac   :  { %v792_v42 = vadd.f32 %v1096_v37, %v787_v40 }
 0x6ae   :  { %v793_v43 = vpack.c.bf16 %v792_v42, %v791_v41 }
 0x6b0   :  { %1027 = vmatmul.msk.bf16.vlgmr.msra.gmra.mxu1 %vm105_vm0, %v793_v43 }
 0x72d   :  { %v826_v62 = vpop.f32.mrf.mxu1 }
 0x72e   :  { %v1517_v45 = vadd.f32 %v1097_v44, %v826_v62 }
 0x730   :  { %v1520_v55 = vmul.f32 0.70710677, %v1517_v45 }
 0x732   :  { %v835_v47 = vmul.f32 %v1520_v55, %v1520_v55 }
 0x734   :  { %v836_v46 = vmin.f32 %v835_v47, 16.0 }
 0x735   :  { %v828_v48 = vpop.f32.mrf.mxu1 }
 0x736   :  { %v837_v49 = vmul.f32 2.1237322e-06, %v836_v46  ;;  %v848_v50 = vmul.f32 3.8918573e-05, %v836_v46  ;;  %v1524_v51 = vadd.f32 %v1097_v44, %v828_v48 }
 0x738   :  { %v838_v52 = vadd.f32 0.00028619796, %v837_v49  ;;  %v849_v53 = vadd.f32 0.001143296, %v848_v50  ;;  %v1527_v54 = vmul.f32 0.70710677, %v1524_v51 }
 0x73a   :  { %v850_v56 = vmul.f32 %v849_v53, %v836_v46  ;;  %v875_v57 = vmul.f32 %v1527_v54, %v1527_v54  ;;  %v839_v58 = vmul.f32 %v838_v52, %v836_v46 }
 0x73c   :  { %v851_v59 = vadd.f32 0.014752088, %v850_v56  ;;  %v876_v61 = vmin.f32 %v875_v57, 16.0  ;;  %v840_v6 = vadd.f32 0.0036580483, %v839_v58 }
 0x73e   :  { %v852_v63 = vmul.f32 %v851_v59, %v836_v46  ;;  %v877_v4 = vmul.f32 2.1237322e-06, %v876_v61  ;;  %v888_v5 = vmul.f32 3.8918573e-05, %v876_v61  ;;  %v841_v13 = vmul.f32 %v840_v6, %v836_v46 }
 0x740   :  { %v853_v7 = vadd.f32 0.112945676, %v852_v63  ;;  %v878_v0 = vadd.f32 0.00028619796, %v877_v4  ;;  %v889_v8 = vadd.f32 0.001143296, %v888_v5 }
 0x741   :  { %v842_v20 = vadd.f32 0.05243302, %v841_v13 }
 0x742   :  { %v854_v9 = vmul.f32 %v853_v7, %v836_v46  ;;  %v879_v12 = vmul.f32 %v878_v0, %v876_v61  ;;  %v890_v2 = vmul.f32 %v889_v8, %v876_v61  ;;  %v831_v7 = vmul.f32 0.5, %v1517_v45 }
 0x743   :  { %v843_v26 = vmul.f32 %v842_v20, %v836_v46  ;;  %v832_v0 = vmul.f32 0.5, %v1524_v51 }
 0x744   :  { %v855_v14 = vadd.f32 0.4994258, %v854_v9  ;;  %v880_v15 = vadd.f32 0.0036580483, %v879_v12  ;;  %v891_v16 = vadd.f32 0.014752088, %v890_v2 }
 0x745   :  { %v844_v31 = vadd.f32 0.18741608, %v843_v26 }
 0x746   :  { %v856_v17 = vmul.f32 %v855_v14, %v836_v46  ;;  %v892_v19 = vmul.f32 %v891_v16, %v876_v61  ;;  %v881_v22 = vmul.f32 %v880_v15, %v876_v61 }
 0x747   :  { %v845_v35 = vmul.f32 %v844_v31, %v836_v46 }
 0x748   :  { %v857_v21 = vadd.f32 1.0, %v856_v17  ;;  %v893_v23 = vadd.f32 0.112945676, %v892_v19  ;;  %v882_v27 = vadd.f32 0.05243302, %v881_v22 }
 0x749   :  { %v846_v41 = vadd.f32 1.1283791, %v845_v35 }
 0x74a   :  { %1141 = vrcp.f32 %v857_v21  ;;  %v894_v25 = vmul.f32 %v893_v23, %v876_v61  ;;  %v883_v33 = vmul.f32 %v882_v27, %v876_v61  ;;  %v869_v37 = vand.u32 2147483648, %v857_v21 }
 0x74b   :  { %v867_v39 = vand.u32 2147483647, %v857_v21  ;;  %vm863_vm4 = vweird.f32 %v857_v21  ;;  %v847_v49 = vmul.f32 %v846_v41, %v1520_v55 }
 0x74c   :  { %v895_v28 = vadd.f32 0.4994258, %v894_v25  ;;  %v884_v38 = vadd.f32 0.18741608, %v883_v33  ;;  %v870_v44 = vor.u32 1.1754944e-38, %v869_v37 }
 0x74d   :  { %vm868_vm6 = vcmp.eq.f32.partialorder %v867_v39, 8.507059e+37 }
 0x74e   :  { %v896_v29 = vmul.f32 %v895_v28, %v876_v61  ;;  %v885_v62 = vmul.f32 %v884_v38, %v876_v61 }
 0x750   :  { %v1142_v30 = vpop.eup %1141  ;;  %v897_v10 = vadd.f32 1.0, %v896_v29  ;;  %v886_v46 = vadd.f32 1.1283791, %v885_v62 }
 0x751   :  { %v859_v32 = vmul.f32 %v1142_v30, %v857_v21  ;;  %vm864_vm3 = vweird.f32 %v1142_v30 }
 0x752   :  { %1143 = vrcp.f32 %v897_v10  ;;  %vm865_vm5 = vmor %vm863_vm4, %vm864_vm3  ;;  %v909_v52 = vand.u32 2147483648, %v897_v10  ;;  %v907_v57 = vand.u32 2147483647, %v897_v10  ;;  %vm903_vm8 = vweird.f32 %v897_v10 }
 0x753   :  { %v860_v34 = vsub.f32 1.0, %v859_v32  ;;  %v887_v1 = vmul.f32 %v886_v46, %v1527_v54  ;;  %v1098_v54 = vld [vmem:[%s1571_s11] ss:$0 sm:$0xff] }
 0x754   :  { %v910_v59 = vor.u32 1.1754944e-38, %v909_v52  ;;  %vm908_vm10 = vcmp.eq.f32.partialorder %v907_v57, 8.507059e+37 }
 0x755   :  { %v861_v36 = vmul.f32 %v1142_v30, %v860_v34 }
 0x757   :  { %v862_v40 = vadd.f32 %v1142_v30, %v861_v36 }
 0x758   :  { %v1144_v42 = vpop.eup %1143 }
 0x759   :  { %v866_v43 = vsel %vm865_vm5, %v1142_v30, %v862_v40  ;;  %v899_v47 = vmul.f32 %v1144_v42, %v897_v10  ;;  %vm904_vm7 = vweird.f32 %v1144_v42 }
 0x75a   :  { %v871_v48 = vsel %vm868_vm6, %v870_v44, %v866_v43  ;;  %vm905_vm9 = vmor %vm903_vm8, %vm904_vm7 }
 0x75b   :  { %v900_v50 = vsub.f32 1.0, %v899_v47  ;;  %v872_v53 = vmul.f32 %v871_v48, %v847_v49 }
 0x75d   :  { %v901_v56 = vmul.f32 %v1144_v42, %v900_v50  ;;  %v1028_v63 = vclamps-f32 %v872_v53, 1.0 }
 0x75f   :  { %v902_v58 = vadd.f32 %v1144_v42, %v901_v56  ;;  %v915_v6 = vadd.f32 1.0, %v1028_v63 }
 0x761   :  { %v906_v61 = vsel %vm905_vm9, %v1144_v42, %v902_v58  ;;  %v917_v9 = vmul.f32 %v915_v6, %v831_v7 }
 0x762   :  { %v911_v4 = vsel %vm908_vm10, %v910_v59, %v906_v61 }
 0x763   :  { %v912_v5 = vmul.f32 %v911_v4, %v887_v1 }
 0x765   :  { %v1029_v55 = vclamps-f32 %v912_v5, 1.0 }
 0x767   :  { %v916_v8 = vadd.f32 1.0, %v1029_v55 }
 0x769   :  { %v918_v11 = vmul.f32 %v916_v8, %v832_v0 }
 0x76b   :  { %v919_v12 = vpack.c.bf16 %v918_v11, %v917_v9 }
 0x76d   :  { %1046 = vmatmul.msk.bf16.vlgmr.msra.gmra.mxu2 %vm956_vm11, %v919_v12 }
 0x7f0   :  { %v969_v2 = vpop.f32.mrf.mxu2 }
 0x7f1   :  { %v970_v13 = vadd.f32 %v1098_v54, %v969_v2 }
 0x7f3   :  { %v974_v14 = vadd.f32 %v970_v13, %v1490_v60 }
 0x7f5   :  { %976 = vst.msk [vmem:[%s1572_s12] sm:$0xff] %vm105_vm0, %v974_v14 }
 0x7f8   :  { %v971_v45 = vpop.f32.mrf.mxu2 }
 0x7f9   :  { %v972_v51 = vadd.f32 %v1098_v54, %v971_v45 }
 0x7fb   :  { %v975_v15 = vadd.f32 %v972_v51, %v1495_v3 }
 0x7fd   :  { %977 = vst.msk [vmem:[%s1572_s12 + $0x8] sm:$0xff] %vm105_vm0, %v975_v15 }
 0x7fe   :  { %982 = vsyncpa [#allocation3], 1 }
 0x7ff   :  { %983 = vsyncpa [#allocation5], 1 }
 0x800   :  { %984 = vsyncpa [#allocation8], 1 }

// kernel: transformer_forward.3
= control target key start
LH: loop header
LB: loop body
LE: loop exit
PB: predicated region body
PF: predicated region fallthrough
CT: control target
= control target key end

     0   :  { %vm47_vm0 = vcmask 261120   ;;  %s1430_s0 = inlined_call_operand.vmem [shape: f32[2,8,32], index: 0, kind: input, shape index: {}]   ;;  %s1431_s1 = inlined_call_operand.vmem [shape: f32[1,32], index: 1, kind: input, shape index: {}]   ;;  %s1432_s2 = inlined_call_operand.vmem [shape: f32[1,32], index: 2, kind: input, shape index: {}]   ;;  %s1433_s3 = inlined_call_operand.vmem [shape: bf16[32,96], index: 3, kind: input, shape index: {}]   ;;  %s1434_s4 = inlined_call_operand.vmem [shape: bf16[32,32], index: 4, kind: input, shape index: {}]   ;;  %s1435_s5 = inlined_call_operand.vmem [shape: f32[1,32], index: 5, kind: input, shape index: {}]   ;;  %s1436_s6 = inlined_call_operand.vmem [shape: f32[1,32], index: 6, kind: input, shape index: {}]   ;;  %s1437_s7 = inlined_call_operand.vmem [shape: f32[1,32], index: 7, kind: input, shape index: {}]   ;;  %s1438_s8 = inlined_call_operand.vmem [shape: bf16[32,64], index: 8, kind: input, shape index: {}]   ;;  %s1439_s9 = inlined_call_operand.vmem [shape: f32[1,64], index: 9, kind: input, shape index: {}]   ;;  %s1440_s10 = inlined_call_operand.vmem [shape: bf16[64,32], index: 10, kind: input, shape index: {}]   ;;  %s1441_s11 = inlined_call_operand.vmem [shape: f32[1,32], index: 11, kind: input, shape index: {}]   ;;  %s1442_s12 = inlined_call_operand.hbm [shape: f32[2,8,32], index: 12, kind: output, shape index: {}]  }
   0x1   :  { %v1206_v0 = vld [vmem:[%s1430_s0] sm:$0xff] }
   0x2   :  { %v48_v1 = vsel %vm47_vm0, %v1206_v0, 0.0 }
   0x3   :  { %49 = vadd.xlane.f32.xlu0 %v48_v1 }
   0x4   :  { %17 = vsyncpa [#allocation3], 0  ;;  %v1213_v2 = vld [vmem:[%s1430_s0 + $0x8] sm:$0xff]  ;;  %v1121_v4 = vmov 32.0   ;;  %v1000_v23 = vld [vmem:[%s1433_s3] sm:$0xff]  ;;  %s1123_s13 = smov 96  }
   0x5   :  { %v51_v3 = vsel %vm47_vm0, %v1213_v2, 0.0  ;;  %1049 = vrcp.f32 %v1121_v4  ;;  %v1001_v21 = vld [vmem:[%s1433_s3 + $0x8] sm:$0xff]  ;;  %v1042_v42 = vld [vmem:[%s1431_s1] ss:$0 sm:$0xff]  ;;  %s1122_s1 = smov 88   ;;  %s1125_s14 = smov 72  }
   0x6   :  { %135 = vmatpush.bf16.msra.mxu0 %v1001_v21  ;;  %v1043_v47 = vld [vmem:[%s1432_s2] ss:$0 sm:$0xff]  ;;  %s1124_s2 = smov 80   ;;  %s1126_s15 = smov 112   ;;  %vm154_vm8 = vcmask 64512   ;;  %vm227_vm9 = vcmask 1043456  }
   0x7   :  { %s1127_s16 = smov 120   ;;  %s1128_s17 = smov 104   ;;  %vm633_vm10 = vcmask 130048   ;;  %vm636_vm11 = vcmask 195584  }
   0x8   :  { %s1129_s18 = smov 64   ;;  %s1130_s19 = smov 56  }
   0x9   :  { %s1131_s20 = smov 48   ;;  %s1132_s21 = smov 40  }
   0xa   :  { %136 = vmatpush.bf16.msra.mxu0 %v1000_v23  ;;  %s1133_s22 = smov 8   ;;  %s1134_s23 = smov 16  }
   0xb   :  { %52 = vadd.xlane.f32.xlu0 %v51_v3  ;;  %v1050_v5 = vpop.eup %1049  ;;  %s1135_s24 = smov 24   ;;  %s926_s26 = sshll.u32 %s1442_s12, 4  ;;  %s927_s26 = int_to_ptr.hbm [resolvable:$true] %s926_s26 }
   0xc   :  { %v55_v6 = vmul.f32 32.0, %v1050_v5  ;;  %vm59_vm1 = vweird.f32 %v1050_v5 }
   0xe   :  { %v56_v7 = vsub.f32 1.0, %v55_v6 }
  0x10   :  { %v57_v8 = vmul.f32 %v1050_v5, %v56_v7 }
  0x12   :  { %v58_v9 = vadd.f32 %v1050_v5, %v57_v8 }
  0x14   :  { %v1217_v10 = vsel %vm59_vm1, %v1050_v5, %v58_v9 }
  0x76   :  { %v50_v11 = vpop.xlane.xlu0 %49 }
  0x77   :  { %v61_v12 = vmul.f32 %v1217_v10, %v50_v11 }
  0x79   :  { %v63_v13 = vsub.f32 %v1206_v0, %v61_v12 }
  0x7b   :  { %v65_v14 = vmul.f32 %v63_v13, %v63_v13 }
  0x7d   :  { %v67_v15 = vsel %vm47_vm0, %v65_v14, 0.0 }
  0x7e   :  { %68 = vadd.xlane.f32.xlu1 %v67_v15  ;;  %v53_v16 = vpop.xlane.xlu0 %52 }
  0x7f   :  { %v62_v17 = vmul.f32 %v1217_v10, %v53_v16 }
  0x81   :  { %v64_v18 = vsub.f32 %v1213_v2, %v62_v17 }
  0x83   :  { %v66_v19 = vmul.f32 %v64_v18, %v64_v18 }
  0x85   :  { %v70_v20 = vsel %vm47_vm0, %v66_v19, 0.0 }
  0x86   :  { %71 = vadd.xlane.f32.xlu1 %v70_v20 }
  0xf1   :  { %v69_v22 = vpop.xlane.xlu1 %68 }
  0xf2   :  { %v73_v24 = vmul.f32 %v69_v22, %v1217_v10 }
  0xf4   :  { %v75_v25 = vadd.f32 1e-05, %v73_v24 }
  0xf6   :  { %1051 = vrsqrt.f32 %v75_v25  ;;  %vm83_vm3 = vweird.f32 %v75_v25 }
  0xf9   :  { %v72_v26 = vpop.xlane.xlu1 %71 }
  0xfa   :  { %v74_v27 = vmul.f32 %v72_v26, %v1217_v10 }
  0xfc   :  { %v1052_v28 = vpop.eup %1051  ;;  %v76_v29 = vadd.f32 1e-05, %v74_v27 }
  0xfd   :  { %v78_v30 = vmul.f32 %v1052_v28, %v75_v25  ;;  %vm84_vm2 = vweird.f32 %v1052_v28 }
  0xfe   :  { %1053 = vrsqrt.f32 %v76_v29  ;;  %vm85_vm4 = vmor %vm83_vm3, %vm84_vm2  ;;  %vm93_vm6 = vweird.f32 %v76_v29 }
  0xff   :  { %v79_v31 = vmul.f32 %v1052_v28, %v78_v30 }
 0x101   :  { %v80_v32 = vmul.f32 0.5, %v79_v31 }
 0x103   :  { %v81_v33 = vsub.f32 1.5, %v80_v32 }
 0x104   :  { %v1054_v34 = vpop.eup %1053 }
 0x105   :  { %v82_v35 = vmul.f32 %v1052_v28, %v81_v33  ;;  %v88_v36 = vmul.f32 %v1054_v34, %v76_v29  ;;  %vm94_vm5 = vweird.f32 %v1054_v34 }
 0x106   :  { %vm95_vm7 = vmor %vm93_vm6, %vm94_vm5 }
 0x107   :  { %v89_v37 = vmul.f32 %v1054_v34, %v88_v36  ;;  %v86_v38 = vsel %vm85_vm4, %v1052_v28, %v82_v35 }
 0x108   :  { %v97_v41 = vmul.f32 %v86_v38, %v63_v13 }
 0x109   :  { %v90_v39 = vmul.f32 0.5, %v89_v37 }
 0x10a   :  { %v102_v46 = vmul.f32 %v1042_v42, %v97_v41 }
 0x10b   :  { %v91_v40 = vsub.f32 1.5, %v90_v39 }
 0x10c   :  { %v107_v49 = vadd.f32 %v1043_v47, %v102_v46 }
 0x10d   :  { %v92_v43 = vmul.f32 %v1054_v34, %v91_v40 }
 0x10f   :  { %v96_v44 = vsel %vm95_vm7, %v1054_v34, %v92_v43 }
 0x110   :  { %v98_v45 = vmul.f32 %v96_v44, %v64_v18 }
 0x112   :  { %v103_v48 = vmul.f32 %v1042_v42, %v98_v45 }
 0x114   :  { %v108_v50 = vadd.f32 %v1043_v47, %v103_v48 }
 0x116   :  { %v109_v51 = vpack.c.bf16 %v108_v50, %v107_v49 }
 0x118   :  { %946 = vmatmul.msk.bf16.vlgmr.msra.gmra.mxu0 %vm47_vm0, %v109_v51 }
 0x195   :  { %v138_v52 = vpop.f32.mrf.mxu0 }
 0x196   :  { %v147_v53 = vpack.c.bf16 %v138_v52, %v138_v52  ;;  %v143_v59 = vmul.f32 0.35355338, %v138_v52 }
 0x198   :  { %v150_v54 = vunpack.c.l.b16 %v147_v53  ;;  %v145_v63 = vpack.c.bf16 %v143_v59, %v143_v59 }
 0x19a   :  { %v1240_v55 = vpack.c.b16 %v150_v54, %v150_v54  ;;  %v266_v3 = vunpack.c.l.b16 %v145_v63 }
 0x19c   :  { %270 = vrot.lane.b32.xlu0 %v1240_v55, %s1122_s1  ;;  %152 = vrot.lane.b32.xlu2 %v1240_v55, %s1123_s13  ;;  %v267_v5 = vpack.c.b16 %v266_v3, %v266_v3 }
 0x19d   :  { %v140_v56 = vpop.f32.mrf.mxu0 }
 0x19e   :  { %v144_v57 = vmul.f32 0.35355338, %v140_v56  ;;  %v148_v58 = vpack.c.bf16 %v140_v56, %v140_v56 }
 0x1a0   :  { %v175_v60 = vunpack.c.l.b16 %v148_v58  ;;  %v146_v61 = vpack.c.bf16 %v144_v57, %v144_v57 }
 0x1a2   :  { %v1244_v62 = vpack.c.b16 %v175_v60, %v175_v60  ;;  %v292_v1 = vunpack.c.l.b16 %v146_v61 }
 0x1a4   :  { %408 = vrot.lane.b32.xlu0 %v1244_v62, %s1124_s2  ;;  %296 = vrot.lane.b32.xlu1 %v1244_v62, %s1122_s1  ;;  %v293_v4 = vpack.c.b16 %v292_v1, %v292_v1 }
 0x1a5   :  { %177 = vrot.lane.b32.xlu2 %v1244_v62, %s1123_s13 }
 0x1ac   :  { %497 = vrot.lane.b32.xlu0 %v1240_v55, %s1125_s14  ;;  %406 = vrot.lane.b32.xlu1 %v293_v4, %s1126_s15 }
 0x1ad   :  { %268 = vrot.lane.b32.xlu2 %v267_v5, %s1127_s16 }
 0x1b4   :  { %518 = vrot.lane.b32.xlu0 %v293_v4, %s1128_s17  ;;  %495 = vrot.lane.b32.xlu1 %v267_v5, %s1128_s17 }
 0x1b5   :  { %294 = vrot.lane.b32.xlu2 %v293_v4, %s1127_s16 }
 0x1bd   :  { %385 = vrot.lane.b32.xlu2 %v1240_v55, %s1124_s2 }
 0x1c5   :  { %383 = vrot.lane.b32.xlu2 %v267_v5, %s1126_s15 }
 0x1cd   :  { %520 = vrot.lane.b32.xlu2 %v1244_v62, %s1125_s14 }
 0x1f6   :  { %v153_v6 = vpop.permute.xlu2 %152 }
 0x1f7   :  { %v159_v7 = vsel %vm154_vm8, %v153_v6, 0 }
 0x1f8   :  { %168 = vmatpush.bf16.xpose.msra.mxu1 %v159_v7 }
 0x1ff   :  { %v178_v8 = vpop.permute.xlu2 %177  ;;  %947 = vmatmul.msk.bf16.vlgmr.msra.gmra.mxu1 %vm154_vm8, %v145_v63 }
 0x200   :  { %v183_v9 = vsel %vm154_vm8, %v178_v8, 0 }
 0x201   :  { %192 = vmatpush.bf16.xpose.msra.mxu2 %v183_v9 }
 0x207   :  { %v269_v11 = vpop.permute.xlu2 %268 }
 0x208   :  { %948 = vmatmul.msk.bf16.vlgmr.msra.gmra.mxu2 %vm154_vm8, %v146_v61 }
 0x20e   :  { %v271_v12 = vpop.permute.xlu0 %270 }
 0x20f   :  { %v295_v13 = vpop.permute.xlu2 %294  ;;  %v276_v14 = vsel %vm154_vm8, %v271_v12, 0 }
 0x210   :  { %285 = vmatpush.bf16.xpose.msrb.mxu0 %v276_v14 }
 0x216   :  { %v409_v15 = vpop.permute.xlu0 %408  ;;  %v297_v16 = vpop.permute.xlu1 %296 }
 0x217   :  { %v414_v17 = vsel %vm154_vm8, %v409_v15, 0  ;;  %v386_v18 = vpop.permute.xlu2 %385  ;;  %951 = vmatmul.msk.bf16.vlgmr.msrb.gmra.mxu0 %vm154_vm8, %v269_v11  ;;  %v302_v19 = vsel %vm154_vm8, %v297_v16, 0 }
 0x218   :  { %v391_v20 = vsel %vm154_vm8, %v386_v18, 0  ;;  %311 = vmatpush.bf16.xpose.msrb.mxu1 %v302_v19 }
 0x219   :  { %400 = vmatpush.bf16.xpose.msra.mxu0 %v391_v20 }
 0x21e   :  { %v498_v21 = vpop.permute.xlu0 %497  ;;  %v407_v26 = vpop.permute.xlu1 %406 }
 0x21f   :  { %v503_v22 = vsel %vm154_vm8, %v498_v21, 0  ;;  %v384_v23 = vpop.permute.xlu2 %383  ;;  %952 = vmatmul.msk.bf16.vlgmr.msrb.gmra.mxu1 %vm154_vm8, %v295_v13 }
 0x220   :  { %423 = vmatpush.bf16.xpose.msra.mxu1 %v414_v17 }
 0x221   :  { %512 = vmatpush.bf16.xpose.msrb.mxu0 %v503_v22 }
 0x226   :  { %v496_v27 = vpop.permute.xlu1 %495  ;;  %v519_v28 = vpop.permute.xlu0 %518 }
 0x227   :  { %v521_v24 = vpop.permute.xlu2 %520  ;;  %955 = vmatmul.msk.bf16.vlgmr.msra.gmra.mxu0 %vm154_vm8, %v384_v23 }
 0x228   :  { %v526_v25 = vsel %vm154_vm8, %v521_v24, 0 }
 0x229   :  { %535 = vmatpush.bf16.xpose.msrb.mxu1 %v526_v25 }
 0x22f   :  { %956 = vmatmul.msk.bf16.vlgmr.msra.gmra.mxu1 %vm154_vm8, %v407_v26 }
 0x237   :  { %959 = vmatmul.msk.bf16.vlgmr.msrb.gmra.mxu0 %vm154_vm8, %v496_v27 }
 0x23f   :  { %960 = vmatmul.msk.bf16.vlgmr.msrb.gmra.mxu1 %vm154_vm8, %v519_v28 }
 0x27c   :  { %v170_v29 = vpop.f32.mrf.mxu1 }
 0x27d   :  { %v198_v30 = vsel %vm154_vm8, %v170_v29, -inf }
 0x27e   :  { %199 = vmax.xlane.f32.xlu2 %v198_v30 }
 0x284   :  { %v172_v31 = vpop.f32.mrf.mxu1 }
 0x28b   :  { %v194_v32 = vpop.f32.mrf.mxu2 }
 0x28c   :  { %v201_v33 = vsel %vm154_vm8, %v194_v32, -inf }
 0x28d   :  { %202 = vmax.xlane.f32.xlu1 %v201_v33 }
 0x293   :  { %v196_v34 = vpop.f32.mrf.mxu2 }
 0x294   :  { %v287_v35 = vpop.f32.mrf.mxu0 }
 0x295   :  { %v317_v36 = vsel %vm154_vm8, %v287_v35, -inf }
 0x296   :  { %318 = vmax.xlane.f32.xlu0 %v317_v36  ;;  %244 = vrot.lane.b32.xlu2 %v1244_v62, %s1129_s18 }
 0x29c   :  { %v289_v37 = vpop.f32.mrf.mxu0  ;;  %v313_v38 = vpop.f32.mrf.mxu1 }
 0x29d   :  { %v320_v48 = vsel %vm154_vm8, %v313_v38, -inf }
 0x29e   :  { %362 = vrot.lane.b32.xlu2 %v1244_v62, %s1130_s19 }
 0x2a4   :  { %v315_v39 = vpop.f32.mrf.mxu1  ;;  %v402_v40 = vpop.f32.mrf.mxu0 }
 0x2a5   :  { %v429_v50 = vsel %vm154_vm8, %v402_v40, -inf }
 0x2a6   :  { %222 = vrot.lane.b32.xlu1 %v1240_v55, %s1129_s18 }
 0x2aa   :  { %341 = vrot.lane.b32.xlu0 %v1240_v55, %s1130_s19 }
 0x2ac   :  { %v404_v41 = vpop.f32.mrf.mxu0  ;;  %v1275_v42 = vpop.f32.mrf.mxu1 }
 0x2ad   :  { %v432_v51 = vsel %vm154_vm8, %v1275_v42, -inf }
 0x2b4   :  { %v427_v43 = vpop.f32.mrf.mxu1  ;;  %v1277_v44 = vpop.f32.mrf.mxu0 }
 0x2b5   :  { %v541_v52 = vsel %vm154_vm8, %v1277_v44, -inf }
 0x2bc   :  { %v516_v45 = vpop.f32.mrf.mxu0  ;;  %v1279_v46 = vpop.f32.mrf.mxu1 }
 0x2bd   :  { %v544_v49 = vsel %vm154_vm8, %v1279_v46, -inf }
 0x2c4   :  { %v539_v47 = vpop.f32.mrf.mxu1 }
 0x2c7   :  { %321 = vmax.xlane.f32.xlu2 %v320_v48 }
 0x2cf   :  { %545 = vmax.xlane.f32.xlu2 %v544_v49 }
 0x2d0   :  { %430 = vmax.xlane.f32.xlu1 %v429_v50 }
 0x2d4   :  { %433 = vmax.xlane.f32.xlu0 %v432_v51 }
 0x2dc   :  { %542 = vmax.xlane.f32.xlu0 %v541_v52 }
 0x2f1   :  { %v200_v53 = vpop.xlane.xlu2 %199 }
 0x2f2   :  { %v204_v54 = vsub.f32 %v170_v29, %v200_v53 }
 0x2f4   :  { %v206_v56 = vmul.f32 1.442695, %v204_v54 }
 0x2f6   :  { %1055 = vpow2.f32 %v206_v56 }
 0x2f9   :  { %v245_v6 = vpop.permute.xlu2 %244 }
 0x2fa   :  { %v250_v11 = vsel %vm227_vm9, %v245_v6, 0 }
 0x2fc   :  { %v1289_v57 = vpop.eup %1055 }
 0x2fd   :  { %v210_v58 = vsel %vm154_vm8, %v1289_v57, 0.0 }
 0x2fe   :  { %211 = vadd.xlane.f32.xlu2 %v210_v58 }
 0x300   :  { %v203_v59 = vpop.xlane.xlu1 %202 }
 0x301   :  { %v205_v63 = vsub.f32 %v194_v32, %v203_v59  ;;  %v363_v15 = vpop.permute.xlu2 %362 }
 0x302   :  { %v368_v43 = vsel %vm227_vm9, %v363_v15, 0 }
 0x303   :  { %v208_v3 = vmul.f32 1.442695, %v205_v63 }
 0x309   :  { %v319_v60 = vpop.xlane.xlu0 %318 }
 0x30a   :  { %v323_v61 = vsub.f32 %v287_v35, %v319_v60 }
 0x30c   :  { %v325_v1 = vmul.f32 1.442695, %v323_v61 }
 0x30e   :  { %1057 = vpow2.f32 %v325_v1 }
 0x30f   :  { %1059 = vpow2.f32 %v208_v3 }
 0x314   :  { %v1293_v4 = vpop.eup %1057 }
 0x315   :  { %v329_v5 = vsel %vm154_vm8, %v1293_v4, 0.0  ;;  %v1300_v9 = vpop.eup %1059 }
 0x316   :  { %330 = vadd.xlane.f32.xlu0 %v329_v5  ;;  %474 = vrot.lane.b32.xlu2 %v1244_v62, %s1131_s20  ;;  %v213_v14 = vsel %vm154_vm8, %v1300_v9, 0.0 }
 0x318   :  { %v223_v7 = vpop.permute.xlu1 %222 }
 0x319   :  { %v229_v8 = vsel %vm227_vm9, %v223_v7, 0 }
 0x31a   :  { %238 = vmatpush.bf16.msra.mxu3 %v229_v8 }
 0x31c   :  { %v342_v12 = vpop.permute.xlu0 %341 }
 0x31d   :  { %v347_v13 = vsel %vm227_vm9, %v342_v12, 0 }
 0x31e   :  { %259 = vmatpush.bf16.msrb.mxu3 %v250_v11  ;;  %356 = vmatpush.bf16.msrb.mxu2 %v347_v13 }
 0x31f   :  { %214 = vadd.xlane.f32.xlu0 %v213_v14 }
 0x33a   :  { %v322_v16 = vpop.xlane.xlu2 %321 }
 0x33b   :  { %v324_v17 = vsub.f32 %v313_v38, %v322_v16 }
 0x33d   :  { %v327_v18 = vmul.f32 1.442695, %v324_v17 }
 0x33f   :  { %1061 = vpow2.f32 %v327_v18 }
 0x342   :  { %v546_v36 = vpop.xlane.xlu2 %545 }
 0x343   :  { %v431_v19 = vpop.xlane.xlu1 %430  ;;  %v548_v39 = vsub.f32 %v1279_v46, %v546_v36 }
 0x344   :  { %v435_v20 = vsub.f32 %v402_v40, %v431_v19 }
 0x345   :  { %v1062_v21 = vpop.eup %1061 }
 0x346   :  { %v437_v22 = vmul.f32 1.442695, %v435_v20  ;;  %v332_v23 = vsel %vm154_vm8, %v1062_v21, 0.0 }
 0x347   :  { %v434_v24 = vpop.xlane.xlu0 %433  ;;  %333 = vadd.xlane.f32.xlu1 %v332_v23 }
 0x348   :  { %1063 = vpow2.f32 %v437_v22  ;;  %v436_v25 = vsub.f32 %v1275_v42, %v434_v24  ;;  %v551_v42 = vmul.f32 1.442695, %v548_v39 }
 0x34a   :  { %v439_v26 = vmul.f32 1.442695, %v436_v25 }
 0x34c   :  { %1065 = vpow2.f32 %v439_v26 }
 0x34e   :  { %v1308_v27 = vpop.eup %1063 }
 0x34f   :  { %v543_v28 = vpop.xlane.xlu0 %542  ;;  %v441_v29 = vsel %vm154_vm8, %v1308_v27, 0.0 }
 0x350   :  { %v547_v30 = vsub.f32 %v1277_v44, %v543_v28  ;;  %442 = vadd.xlane.f32.xlu2 %v441_v29 }
 0x352   :  { %v1066_v31 = vpop.eup %1065  ;;  %v549_v32 = vmul.f32 1.442695, %v547_v30 }
 0x353   :  { %v444_v33 = vsel %vm154_vm8, %v1066_v31, 0.0 }
 0x354   :  { %1067 = vpow2.f32 %v549_v32  ;;  %445 = vadd.xlane.f32.xlu0 %v444_v33 }
 0x35a   :  { %v1314_v34 = vpop.eup %1067 }
 0x35b   :  { %v553_v35 = vsel %vm154_vm8, %v1314_v34, 0.0 }
 0x35c   :  { %554 = vadd.xlane.f32.xlu0 %v553_v35 }
 0x360   :  { %453 = vrot.lane.b32.xlu1 %v1240_v55, %s1131_s20 }
 0x368   :  { %586 = vrot.lane.b32.xlu2 %v1244_v62, %s1132_s21 }
 0x370   :  { %565 = vrot.lane.b32.xlu0 %v1240_v55, %s1132_s21 }
 0x371   :  { %v212_v37 = vpop.xlane.xlu2 %211 }
 0x372   :  { %1069 = vrcp.f32 %v212_v37 }
 0x373   :  { %1071 = vpow2.f32 %v551_v42 }
 0x378   :  { %v1070_v38 = vpop.eup %1069 }
 0x379   :  { %v218_v40 = vmul.f32 %v1070_v38, %v1289_v57  ;;  %v1072_v44 = vpop.eup %1071  ;;  %v475_v51 = vpop.permute.xlu2 %474 }
 0x37a   :  { %v556_v45 = vsel %vm154_vm8, %v1072_v44, 0.0  ;;  %v480_v53 = vsel %vm227_vm9, %v475_v51, 0 }
 0x37b   :  { %v220_v41 = vpack.c.bf16 %v218_v40, %v218_v40  ;;  %v1003_v40 = vld [vmem:[%s1434_s4 + $0x8] sm:$0xff] }
 0x37c   :  { %669 = vmatpush.bf16.msra.mxu0 %v1003_v40 }
 0x37d   :  { %949 = vmatmul.msk.bf16.vlgmr.msra.gmra.mxu3 %vm154_vm8, %v220_v41  ;;  %v1002_v41 = vld [vmem:[%s1434_s4] sm:$0xff] }
 0x37e   :  { %377 = vmatpush.bf16.msra.mxu3 %v368_v43 }
 0x380   :  { %670 = vmatpush.bf16.msra.mxu0 %v1002_v41 }
 0x389   :  { %v331_v62 = vpop.xlane.xlu0 %330 }
 0x38a   :  { %1073 = vrcp.f32 %v331_v62  ;;  %557 = vadd.xlane.f32.xlu1 %v556_v45 }
 0x390   :  { %v1074_v55 = vpop.eup %1073 }
 0x391   :  { %v337_v47 = vmul.f32 %v1074_v55, %v1293_v4 }
 0x392   :  { %v215_v46 = vpop.xlane.xlu0 %214 }
 0x393   :  { %1075 = vrcp.f32 %v215_v46  ;;  %v339_v48 = vpack.c.bf16 %v337_v47, %v337_v47 }
 0x395   :  { %953 = vmatmul.msk.bf16.vlgmr.msrb.gmra.mxu2 %vm154_vm8, %v339_v48 }
 0x399   :  { %v1076_v49 = vpop.eup %1075 }
 0x39a   :  { %v219_v50 = vmul.f32 %v1076_v49, %v1300_v9 }
 0x39c   :  { %v221_v52 = vpack.c.bf16 %v219_v50, %v219_v50 }
 0x39e   :  { %950 = vmatmul.msk.bf16.vlgmr.msrb.gmra.mxu3 %vm154_vm8, %v221_v52 }
 0x39f   :  { %489 = vmatpush.bf16.msrb.mxu3 %v480_v53 }
 0x3ba   :  { %v334_v54 = vpop.xlane.xlu1 %333 }
 0x3bb   :  { %1077 = vrcp.f32 %v334_v54 }
 0x3c1   :  { %v1078_v56 = vpop.eup %1077 }
 0x3c2   :  { %v338_v57 = vmul.f32 %v1078_v56, %v1062_v21 }
 0x3c3   :  { %v443_v58 = vpop.xlane.xlu2 %442 }
 0x3c4   :  { %v340_v59 = vpack.c.bf16 %v338_v57, %v338_v57  ;;  %1079 = vrcp.f32 %v443_v58  ;;  %v1044_v57 = vld [vmem:[%s1435_s5] ss:$0 sm:$0xff] }
 0x3c6   :  { %954 = vmatmul.msk.bf16.vlgmr.msra.gmra.mxu3 %vm154_vm8, %v340_v59 }
 0x3c7   :  { %v446_v60 = vpop.xlane.xlu0 %445 }
 0x3c8   :  { %1081 = vrcp.f32 %v446_v60 }
 0x3ca   :  { %v1080_v1 = vpop.eup %1079 }
 0x3cb   :  { %v587_v61 = vpop.permute.xlu2 %586  ;;  %v449_v5 = vmul.f32 %v1080_v1, %v1308_v27 }
 0x3cc   :  { %v592_v63 = vsel %vm227_vm9, %v587_v61, 0 }
 0x3cd   :  { %601 = vmatpush.bf16.msra.mxu3 %v592_v63  ;;  %v451_v9 = vpack.c.bf16 %v449_v5, %v449_v5 }
 0x3ce   :  { %v1082_v3 = vpop.eup %1081 }
 0x3cf   :  { %v450_v4 = vmul.f32 %v1082_v3, %v1066_v31  ;;  %v555_v11 = vpop.xlane.xlu0 %554 }
 0x3d0   :  { %1083 = vrcp.f32 %v555_v11 }
 0x3d1   :  { %v452_v8 = vpack.c.bf16 %v450_v4, %v450_v4 }
 0x3d2   :  { %v454_v6 = vpop.permute.xlu1 %453 }
 0x3d3   :  { %v459_v7 = vsel %vm227_vm9, %v454_v6, 0 }
 0x3d4   :  { %468 = vmatpush.bf16.msra.mxu2 %v459_v7 }
 0x3d6   :  { %958 = vmatmul.msk.bf16.vlgmr.msrb.gmra.mxu3 %vm154_vm8, %v452_v8  ;;  %v1084_v12 = vpop.eup %1083 }
 0x3d7   :  { %957 = vmatmul.msk.bf16.vlgmr.msra.gmra.mxu2 %vm154_vm8, %v451_v9  ;;  %v561_v13 = vmul.f32 %v1084_v12, %v1314_v34 }
 0x3d9   :  { %v563_v16 = vpack.c.bf16 %v561_v13, %v561_v13 }
 0x3e2   :  { %v566_v14 = vpop.permute.xlu0 %565 }
 0x3e3   :  { %v571_v15 = vsel %vm227_vm9, %v566_v14, 0  ;;  %v1005_v14 = vld [vmem:[%s1438_s8 + $0x8] sm:$0xff] }
 0x3e4   :  { %580 = vmatpush.bf16.msrb.mxu2 %v571_v15  ;;  %765 = vmatpush.bf16.msra.mxu1 %v1005_v14 }
 0x3e7   :  { %961 = vmatmul.msk.bf16.vlgmr.msrb.gmra.mxu2 %vm154_vm8, %v563_v16 }
 0x3fd   :  { %v558_v17 = vpop.xlane.xlu1 %557 }
 0x3fe   :  { %1085 = vrcp.f32 %v558_v17 }
 0x400   :  { %v240_v18 = vpop.f32.mrf.mxu3 }
 0x404   :  { %v1086_v19 = vpop.eup %1085 }
 0x405   :  { %v562_v20 = vmul.f32 %v1086_v19, %v1072_v44 }
 0x407   :  { %v564_v21 = vpack.c.bf16 %v562_v20, %v562_v20 }
 0x408   :  { %v242_v22 = vpop.f32.mrf.mxu3 }
 0x409   :  { %962 = vmatmul.msk.bf16.vlgmr.msra.gmra.mxu3 %vm154_vm8, %v564_v21 }
 0x418   :  { %v358_v23 = vpop.f32.mrf.mxu2 }
 0x420   :  { %v360_v25 = vpop.f32.mrf.mxu2 }
 0x421   :  { %v261_v24 = vpop.f32.mrf.mxu3 }
 0x429   :  { %v263_v26 = vpop.f32.mrf.mxu3 }
 0x449   :  { %v379_v27 = vpop.f32.mrf.mxu3 }
 0x44a   :  { %v1027_v28 = vpack.i.bf16 %v379_v27, %v358_v23 }
 0x44c   :  { %1028 = vrot.lane.b32.xlu0 %v1027_v28, %s1133_s22 }
 0x451   :  { %v381_v29 = vpop.f32.mrf.mxu3 }
 0x459   :  { %v491_v30 = vpop.f32.mrf.mxu3 }
 0x45a   :  { %v470_v31 = vpop.f32.mrf.mxu2 }
 0x45b   :  { %v1032_v32 = vpack.i.bf16 %v491_v30, %v470_v31 }
 0x45d   :  { %1033 = vrot.lane.b32.xlu2 %v1032_v32, %s1134_s23  ;;  %s1136_s23 = smov [#allocation2]  }
 0x461   :  { %v493_v33 = vpop.f32.mrf.mxu3 }
 0x462   :  { %v472_v34 = vpop.f32.mrf.mxu2 }
 0x46a   :  { %v582_v35 = vpop.f32.mrf.mxu2 }
 0x472   :  { %v584_v36 = vpop.f32.mrf.mxu2 }
 0x48c   :  { %v603_v37 = vpop.f32.mrf.mxu3 }
 0x48d   :  { %v1037_v38 = vpack.i.bf16 %v603_v37, %v582_v35  ;;  %v1046_v37 = vld [vmem:[%s1437_s7] ss:$0 sm:$0xff] }
 0x48f   :  { %1038 = vrot.lane.b32.xlu0 %v1037_v38, %s1135_s24  ;;  %s924_s24 = sshll.u32 %s1136_s23, 4  ;;  %s925_s24 = int_to_ptr.vmem [resolvable:$true] %s924_s24 }
 0x494   :  { %v605_v39 = vpop.f32.mrf.mxu3 }
 0x4b7   :  { %v1034_v62 = vpop.permute.xlu2 %1033 }
 0x4b8   :  { %v1036_v47 = vunpack.i.h.bf16 %v1034_v62  ;;  %v1035_v46 = vunpack.i.l.bf16 %v1034_v62 }
 0x4be   :  { %v1029_v42 = vpop.permute.xlu0 %1028 }
 0x4bf   :  { %v1031_v43 = vunpack.i.h.bf16 %v1029_v42  ;;  %v1030_v44 = vunpack.i.l.bf16 %v1029_v42 }
 0x4c1   :  { %v632_v45 = vsel %vm154_vm8, %v261_v24, %v1031_v43  ;;  %v631_v55 = vsel %vm154_vm8, %v240_v18, %v1030_v44  ;;  %v1004_v18 = vld [vmem:[%s1438_s8] sm:$0xff] }
 0x4c2   :  { %v634_v51 = vsel %vm633_vm10, %v631_v55, %v1035_v46  ;;  %v635_v52 = vsel %vm633_vm10, %v632_v45, %v1036_v47  ;;  %766 = vmatpush.bf16.msra.mxu1 %v1004_v18  ;;  %v1047_v44 = vld [vmem:[%s1439_s9] ss:$0 sm:$0xff]  ;;  %v1007_v18 = vld [vmem:[%s1440_s10 + $0x8] sm:$0xff] }
 0x501   :  { %v1039_v48 = vpop.permute.xlu0 %1038 }
 0x502   :  { %v1041_v49 = vunpack.i.h.bf16 %v1039_v48  ;;  %v1040_v50 = vunpack.i.l.bf16 %v1039_v48 }
 0x504   :  { %v638_v53 = vsel %vm636_vm11, %v635_v52, %v1041_v49  ;;  %v637_v54 = vsel %vm636_vm11, %v634_v51, %v1040_v50  ;;  %vm898_vm11 = vcmask 523264  }
 0x505   :  { %v639_v56 = vpack.c.bf16 %v638_v53, %v637_v54 }
 0x507   :  { %971 = vmatmul.msk.bf16.vlgmr.msra.gmra.mxu0 %vm47_vm0, %v639_v56 }
 0x584   :  { %v672_v58 = vpop.f32.mrf.mxu0 }
 0x585   :  { %v673_v59 = vadd.f32 %v1044_v57, %v672_v58 }
 0x587   :  { %v1356_v60 = vadd.f32 %v673_v59, %v1206_v0 }
 0x589   :  { %v681_v61 = vsel %vm47_vm0, %v1356_v60, 0.0 }
 0x58a   :  { %682 = vadd.xlane.f32.xlu2 %v681_v61 }
 0x58c   :  { %v674_v63 = vpop.f32.mrf.mxu0 }
 0x58d   :  { %v675_v1 = vadd.f32 %v1044_v57, %v674_v63 }
 0x58f   :  { %v1361_v3 = vadd.f32 %v675_v1, %v1213_v2  ;;  %v1009_v1 = vld [vmem:[%s1440_s10 + $0x18] sm:$0xff] }
 0x590   :  { %906 = vmatpush.bf16.msra.mxu2 %v1009_v1 }
 0x591   :  { %v684_v4 = vsel %vm47_vm0, %v1361_v3, 0.0 }
 0x592   :  { %685 = vadd.xlane.f32.xlu0 %v684_v4 }
 0x5fd   :  { %v683_v5 = vpop.xlane.xlu2 %682 }
 0x5fe   :  { %v687_v6 = vmul.f32 %v683_v5, %v1217_v10 }
 0x600   :  { %v689_v7 = vsub.f32 %v1356_v60, %v687_v6 }
 0x602   :  { %v691_v0 = vmul.f32 %v689_v7, %v689_v7 }
 0x604   :  { %v693_v8 = vsel %vm47_vm0, %v691_v0, 0.0 }
 0x605   :  { %v686_v9 = vpop.xlane.xlu0 %685  ;;  %694 = vadd.xlane.f32.xlu1 %v693_v8 }
 0x606   :  { %v688_v11 = vmul.f32 %v686_v9, %v1217_v10 }
 0x608   :  { %v690_v12 = vsub.f32 %v1361_v3, %v688_v11  ;;  %v1008_v11 = vld [vmem:[%s1440_s10 + $0x10] sm:$0xff] }
 0x609   :  { %907 = vmatpush.bf16.msra.mxu2 %v1008_v11 }
 0x60a   :  { %v692_v2 = vmul.f32 %v690_v12, %v690_v12 }
 0x60c   :  { %v696_v13 = vsel %vm47_vm0, %v692_v2, 0.0 }
 0x60d   :  { %697 = vadd.xlane.f32.xlu1 %v696_v13  ;;  %908 = vmatpush.bf16.msra.mxu2 %v1007_v18 }
 0x678   :  { %v695_v15 = vpop.xlane.xlu1 %694 }
 0x679   :  { %v699_v16 = vmul.f32 %v695_v15, %v1217_v10 }
 0x67b   :  { %v701_v17 = vadd.f32 1e-05, %v699_v16 }
 0x67d   :  { %1087 = vrsqrt.f32 %v701_v17  ;;  %vm709_vm13 = vweird.f32 %v701_v17 }
 0x680   :  { %v698_v19 = vpop.xlane.xlu1 %697 }
 0x681   :  { %v700_v20 = vmul.f32 %v698_v19, %v1217_v10  ;;  %v1045_v10 = vld [vmem:[%s1436_s6] ss:$0 sm:$0xff] }
 0x683   :  { %v1088_v21 = vpop.eup %1087  ;;  %v702_v22 = vadd.f32 1e-05, %v700_v20 }
 0x684   :  { %v704_v23 = vmul.f32 %v1088_v21, %v701_v17  ;;  %vm710_vm12 = vweird.f32 %v1088_v21 }
 0x685   :  { %1089 = vrsqrt.f32 %v702_v22  ;;  %vm711_vm14 = vmor %vm709_vm13, %vm710_vm12  ;;  %vm719_vm1 = vweird.f32 %v702_v22 }
 0x686   :  { %v705_v24 = vmul.f32 %v1088_v21, %v704_v23 }
 0x688   :  { %v706_v25 = vmul.f32 0.5, %v705_v24  ;;  %v1006_v24 = vld [vmem:[%s1440_s10] sm:$0xff] }
 0x689   :  { %909 = vmatpush.bf16.msra.mxu2 %v1006_v24 }
 0x68a   :  { %v707_v26 = vsub.f32 1.5, %v706_v25 }
 0x68b   :  { %v1090_v27 = vpop.eup %1089 }
 0x68c   :  { %v708_v28 = vmul.f32 %v1088_v21, %v707_v26  ;;  %v714_v29 = vmul.f32 %v1090_v27, %v702_v22  ;;  %vm720_vm15 = vweird.f32 %v1090_v27 }
 0x68d   :  { %vm721_vm2 = vmor %vm719_vm1, %vm720_vm15 }
 0x68e   :  { %v715_v30 = vmul.f32 %v1090_v27, %v714_v29  ;;  %v712_v31 = vsel %vm711_vm14, %v1088_v21, %v708_v28 }
 0x68f   :  { %v723_v34 = vmul.f32 %v712_v31, %v689_v7 }
 0x690   :  { %v716_v32 = vmul.f32 0.5, %v715_v30 }
 0x691   :  { %v728_v38 = vmul.f32 %v1045_v10, %v723_v34 }
 0x692   :  { %v717_v33 = vsub.f32 1.5, %v716_v32 }
 0x693   :  { %v733_v41 = vadd.f32 %v1046_v37, %v728_v38 }
 0x694   :  { %v718_v35 = vmul.f32 %v1090_v27, %v717_v33 }
 0x696   :  { %v722_v36 = vsel %vm721_vm2, %v1090_v27, %v718_v35 }
 0x697   :  { %v724_v39 = vmul.f32 %v722_v36, %v690_v12 }
 0x699   :  { %v729_v40 = vmul.f32 %v1045_v10, %v724_v39 }
 0x69b   :  { %v734_v42 = vadd.f32 %v1046_v37, %v729_v40 }
 0x69d   :  { %v735_v43 = vpack.c.bf16 %v734_v42, %v733_v41 }
 0x69f   :  { %980 = vmatmul.msk.bf16.vlgmr.msra.gmra.mxu1 %vm47_vm0, %v735_v43 }
 0x71c   :  { %v768_v62 = vpop.f32.mrf.mxu1 }
 0x71d   :  { %v1389_v45 = vadd.f32 %v1047_v44, %v768_v62 }
 0x71f   :  { %v1392_v55 = vmul.f32 0.70710677, %v1389_v45 }
 0x721   :  { %v777_v47 = vmul.f32 %v1392_v55, %v1392_v55 }
 0x723   :  { %v778_v46 = vmin.f32 %v777_v47, 16.0 }
 0x724   :  { %v770_v48 = vpop.f32.mrf.mxu1 }
 0x725   :  { %v779_v49 = vmul.f32 2.1237322e-06, %v778_v46  ;;  %v790_v50 = vmul.f32 3.8918573e-05, %v778_v46  ;;  %v1396_v51 = vadd.f32 %v1047_v44, %v770_v48 }
 0x727   :  { %v780_v52 = vadd.f32 0.00028619796, %v779_v49  ;;  %v791_v53 = vadd.f32 0.001143296, %v790_v50  ;;  %v1399_v54 = vmul.f32 0.70710677, %v1396_v51 }
 0x729   :  { %v792_v56 = vmul.f32 %v791_v53, %v778_v46  ;;  %v817_v57 = vmul.f32 %v1399_v54, %v1399_v54  ;;  %v781_v58 = vmul.f32 %v780_v52, %v778_v46 }
 0x72b   :  { %v793_v59 = vadd.f32 0.014752088, %v792_v56  ;;  %v818_v61 = vmin.f32 %v817_v57, 16.0  ;;  %v782_v6 = vadd.f32 0.0036580483, %v781_v58 }
 0x72d   :  { %v794_v63 = vmul.f32 %v793_v59, %v778_v46  ;;  %v819_v4 = vmul.f32 2.1237322e-06, %v818_v61  ;;  %v830_v5 = vmul.f32 3.8918573e-05, %v818_v61  ;;  %v783_v13 = vmul.f32 %v782_v6, %v778_v46 }
 0x72f   :  { %v795_v7 = vadd.f32 0.112945676, %v794_v63  ;;  %v820_v0 = vadd.f32 0.00028619796, %v819_v4  ;;  %v831_v8 = vadd.f32 0.001143296, %v830_v5 }
 0x730   :  { %v784_v20 = vadd.f32 0.05243302, %v783_v13 }
 0x731   :  { %v796_v9 = vmul.f32 %v795_v7, %v778_v46  ;;  %v821_v12 = vmul.f32 %v820_v0, %v818_v61  ;;  %v832_v2 = vmul.f32 %v831_v8, %v818_v61  ;;  %v773_v7 = vmul.f32 0.5, %v1389_v45 }
 0x732   :  { %v785_v26 = vmul.f32 %v784_v20, %v778_v46  ;;  %v774_v0 = vmul.f32 0.5, %v1396_v51 }
 0x733   :  { %v797_v14 = vadd.f32 0.4994258, %v796_v9  ;;  %v822_v15 = vadd.f32 0.0036580483, %v821_v12  ;;  %v833_v16 = vadd.f32 0.014752088, %v832_v2 }
 0x734   :  { %v786_v31 = vadd.f32 0.18741608, %v785_v26 }
 0x735   :  { %v798_v17 = vmul.f32 %v797_v14, %v778_v46  ;;  %v834_v19 = vmul.f32 %v833_v16, %v818_v61  ;;  %v823_v22 = vmul.f32 %v822_v15, %v818_v61 }
 0x736   :  { %v787_v35 = vmul.f32 %v786_v31, %v778_v46 }
 0x737   :  { %v799_v21 = vadd.f32 1.0, %v798_v17  ;;  %v835_v23 = vadd.f32 0.112945676, %v834_v19  ;;  %v824_v27 = vadd.f32 0.05243302, %v823_v22 }
 0x738   :  { %v788_v41 = vadd.f32 1.1283791, %v787_v35 }
 0x739   :  { %1091 = vrcp.f32 %v799_v21  ;;  %v836_v25 = vmul.f32 %v835_v23, %v818_v61  ;;  %v825_v33 = vmul.f32 %v824_v27, %v818_v61  ;;  %v811_v37 = vand.u32 2147483648, %v799_v21 }
 0x73a   :  { %v809_v39 = vand.u32 2147483647, %v799_v21  ;;  %vm805_vm4 = vweird.f32 %v799_v21  ;;  %v789_v49 = vmul.f32 %v788_v41, %v1392_v55 }
 0x73b   :  { %v837_v28 = vadd.f32 0.4994258, %v836_v25  ;;  %v826_v38 = vadd.f32 0.18741608, %v825_v33  ;;  %v812_v44 = vor.u32 1.1754944e-38, %v811_v37 }
 0x73c   :  { %vm810_vm6 = vcmp.eq.f32.partialorder %v809_v39, 8.507059e+37 }
 0x73d   :  { %v838_v29 = vmul.f32 %v837_v28, %v818_v61  ;;  %v827_v62 = vmul.f32 %v826_v38, %v818_v61 }
 0x73f   :  { %v1092_v30 = vpop.eup %1091  ;;  %v839_v10 = vadd.f32 1.0, %v838_v29  ;;  %v828_v46 = vadd.f32 1.1283791, %v827_v62 }
 0x740   :  { %v801_v32 = vmul.f32 %v1092_v30, %v799_v21  ;;  %vm806_vm3 = vweird.f32 %v1092_v30 }
 0x741   :  { %1093 = vrcp.f32 %v839_v10  ;;  %vm807_vm5 = vmor %vm805_vm4, %vm806_vm3  ;;  %v851_v52 = vand.u32 2147483648, %v839_v10  ;;  %v849_v57 = vand.u32 2147483647, %v839_v10  ;;  %vm845_vm8 = vweird.f32 %v839_v10 }
 0x742   :  { %v802_v34 = vsub.f32 1.0, %v801_v32  ;;  %v829_v1 = vmul.f32 %v828_v46, %v1399_v54  ;;  %v1048_v54 = vld [vmem:[%s1441_s11] ss:$0 sm:$0xff]  ;;  %s1137_s11 = smov 128  }
 0x743   :  { %v852_v59 = vor.u32 1.1754944e-38, %v851_v52  ;;  %vm850_vm10 = vcmp.eq.f32.partialorder %v849_v57, 8.507059e+37 }
 0x744   :  { %v803_v36 = vmul.f32 %v1092_v30, %v802_v34 }
 0x746   :  { %v804_v40 = vadd.f32 %v1092_v30, %v803_v36 }
 0x747   :  { %v1094_v42 = vpop.eup %1093 }
 0x748   :  { %v808_v43 = vsel %vm807_vm5, %v1092_v30, %v804_v40  ;;  %v841_v47 = vmul.f32 %v1094_v42, %v839_v10  ;;  %vm846_vm7 = vweird.f32 %v1094_v42 }
 0x749   :  { %v813_v48 = vsel %vm810_vm6, %v812_v44, %v808_v43  ;;  %vm847_vm9 = vmor %vm845_vm8, %vm846_vm7 }
 0x74a   :  { %v842_v50 = vsub.f32 1.0, %v841_v47  ;;  %v814_v53 = vmul.f32 %v813_v48, %v789_v49 }
 0x74c   :  { %v843_v56 = vmul.f32 %v1094_v42, %v842_v50  ;;  %v981_v63 = vclamps-f32 %v814_v53, 1.0 }
 0x74e   :  { %v844_v58 = vadd.f32 %v1094_v42, %v843_v56  ;;  %v857_v6 = vadd.f32 1.0, %v981_v63 }
 0x750   :  { %v848_v61 = vsel %vm847_vm9, %v1094_v42, %v844_v58  ;;  %v859_v9 = vmul.f32 %v857_v6, %v773_v7 }
 0x751   :  { %v853_v4 = vsel %vm850_vm10, %v852_v59, %v848_v61 }
 0x752   :  { %v854_v5 = vmul.f32 %v853_v4, %v829_v1 }
 0x754   :  { %v982_v55 = vclamps-f32 %v854_v5, 1.0 }
 0x756   :  { %v858_v8 = vadd.f32 1.0, %v982_v55 }
 0x758   :  { %v860_v11 = vmul.f32 %v858_v8, %v774_v0 }
 0x75a   :  { %v861_v12 = vpack.c.bf16 %v860_v11, %v859_v9 }
 0x75c   :  { %999 = vmatmul.msk.bf16.vlgmr.msra.gmra.mxu2 %vm898_vm11, %v861_v12 }
 0x7df   :  { %v911_v2 = vpop.f32.mrf.mxu2 }
 0x7e0   :  { %v912_v13 = vadd.f32 %v1048_v54, %v911_v2 }
 0x7e2   :  { %v916_v14 = vadd.f32 %v912_v13, %v1356_v60 }
 0x7e4   :  { %918 = vst.msk [vmem:[#allocation2] sm:$0xff] %vm47_vm0, %v916_v14 }
 0x7e7   :  { %v913_v45 = vpop.f32.mrf.mxu2 }
 0x7e8   :  { %v914_v51 = vadd.f32 %v1048_v54, %v913_v45 }
 0x7ea   :  { %v917_v15 = vadd.f32 %v914_v51, %v1361_v3 }
 0x7ec   :  { %919 = vst.msk [vmem:[#allocation2 + $0x8] sm:$0xff] %vm47_vm0, %v917_v15 }
 0x7ed   :  { %932 = dma.vmem_to_hbm [thread:$0]  %s925_s24, 256, %s927_s26, [#allocation3], %s1137_s11, %s1137_s11, %s1133_s22  }
 0x7ee   :  { %1119 = dma.done.wait [#allocation3], 256  }
 0x7ef   :  { %1120 = vsyncadd [#allocation3], 4294967040 }
 0x7f0   :  { %937 = vsyncpa [#allocation3], 1 }

</bundles_post_ra>
